<compile_context>
chip_gen: v5e
topology: v5e:2x2
jax: 0.10.0
libtpu: 0.0.40
codegen_flags: <defaults>
</compile_context>

<pallas_src>
import math

import jax
import jax.numpy as jnp
from jax import lax
from jax.experimental import pallas as pl
from jax.experimental.pallas import tpu as pltpu

# ---------------- model dims (small, consistent with the module) ----------------
B = 2        # batch
T = 8        # target (decoder) sequence length
S = 8        # source (encoder) sequence length
D = 32       # d_model ("features")
H = 4        # number of heads
DK = D // H  # head dim
DFF = 64     # feed-forward hidden dim
EPS = 1e-6   # LayerNormalization eps (tutorial-style: alpha*(x-mean)/(std+eps)+bias)

LANES = 128  # lane padding for packed parameter blobs

# bias/LN row indices in the packed (13, 128) blob
#  0: ln1 alpha   1: ln1 bias
#  2: self b_qkv  3: self b_o
#  4: ln2 alpha   5: ln2 bias
#  6: cross b_q   7: cross b_kv   8: cross b_o
#  9: ln3 alpha  10: ln3 bias
# 11: ffn b1     12: ffn b2
# weight segments in the packed (6, D, 128) blob
#  0: self W_qkv(96)  1: self W_o(32)  2: cross W_q(32)
#  3: cross W_kv(64)  4: cross W_o(32) 5: ffn W1(64)


def _decoder_block_kernel(x_ref, enc_ref, mask_ref, wa_ref, w2_ref, bln_ref, o_ref):
    x = x_ref[...]      # (B*T, D)  batch folded into rows
    enc = enc_ref[...]  # (B*S, D)

    def wseg(i, width):                 # packed weight segment
        return wa_ref[i][:, :width]     # (D, width)

    def brow(i, width):                 # packed bias / LN row
        return bln_ref[i:i + 1, :width]  # (1, width)

    def layernorm(v, ia, ib):
        alpha = brow(ia, D)
        beta = brow(ib, D)
        mean = jnp.mean(v, axis=-1, keepdims=True)
        # torch.std is unbiased (ddof=1); tutorial LN divides by (std + eps)
        var = jnp.sum((v - mean) ** 2, axis=-1, keepdims=True) / (D - 1)
        std = jnp.sqrt(var)
        return alpha * (v - mean) / (std + EPS) + beta

    def split_heads(z):                 # (rows, H*DK) -> (H, rows, DK)
        return jnp.stack([z[:, h * DK:(h + 1) * DK] for h in range(H)], axis=0)

    def attention(q, k, v, mask2d):
        # q: (Rq, D), k/v: (Rk, D), mask2d: (Rq, Rk) with 0 = masked.
        # Rows contain the folded batch; mask2d is block-diagonal so cross-batch
        # scores are masked to -1e9 (exp underflows to exactly 0).
        # NOTE: a fully-masked row is a degenerate case (uniform attention) in the
        # reference module; test inputs never contain one.
        qh, kh, vh = split_heads(q), split_heads(k), split_heads(v)
        # batched over heads: (H,Rq,DK) x (H,Rk,DK) -> (H,Rq,Rk)
        s = lax.dot_general(qh, kh, (((2,), (2,)), ((0,), (0,))),
                            preferred_element_type=jnp.float32) * (1.0 / math.sqrt(DK))
        s = jnp.where(mask2d[None, :, :] == 0.0, -1e9, s)
        m = jnp.max(s, axis=-1, keepdims=True)
        e = jnp.exp(s - m)
        denom = jnp.sum(e, axis=-1, keepdims=True)
        inv = pl.reciprocal(denom, approx=True)      # EUP slot (VALU stays free)
        inv = inv * (2.0 - denom * inv)              # one Newton step -> ~fp32 accurate
        p = e * inv
        # (H,Rq,Rk) x (H,Rk,DK) -> (H,Rq,DK)
        pv = lax.dot_general(p, vh, (((2,), (1,)), ((0,), (0,))),
                             preferred_element_type=jnp.float32)
        return jnp.concatenate([pv[h] for h in range(H)], axis=-1)   # (Rq, D)

    # ---- residual 1: x + self_attention(LN(x))  (fused QKV projection) ----
    n1 = layernorm(x, 0, 1)
    qkv = jnp.dot(n1, wseg(0, 3 * D), preferred_element_type=jnp.float32) + brow(2, 3 * D)
    ctx = attention(qkv[:, 0:D], qkv[:, D:2 * D], qkv[:, 2 * D:3 * D], mask_ref[0])
    x = x + jnp.dot(ctx, wseg(1, D), preferred_element_type=jnp.float32) + brow(3, D)

    # ---- residual 2: x + cross_attention(LN(x), enc, enc)  (fused KV projection) ----
    n2 = layernorm(x, 4, 5)
    q2 = jnp.dot(n2, wseg(2, D), preferred_element_type=jnp.float32) + brow(6, D)
    kv = jnp.dot(enc, wseg(3, 2 * D), preferred_element_type=jnp.float32) + brow(7, 2 * D)
    ctx = attention(q2, kv[:, 0:D], kv[:, D:2 * D], mask_ref[1])
    x = x + jnp.dot(ctx, wseg(4, D), preferred_element_type=jnp.float32) + brow(8, D)

    # ---- residual 3: x + FFN(LN(x)) ; ffn = linear -> relu -> (dropout) -> linear ----
    n3 = layernorm(x, 9, 10)
    hid = jnp.maximum(
        jnp.dot(n3, wseg(5, DFF), preferred_element_type=jnp.float32) + brow(11, DFF), 0.0)
    x = x + jnp.dot(hid, w2_ref[...], preferred_element_type=jnp.float32) + brow(12, D)

    o_ref[...] = x.astype(o_ref.dtype)


# ---------------- wrapper: parameter/mask packing + pallas_call -------------------
def _pad_lanes(w):
    return jnp.pad(w, ((0, 0), (0, LANES - w.shape[-1])))


def _pad_row(b):
    b = b.reshape(1, -1)
    return jnp.pad(b, ((0, 0), (0, LANES - b.shape[-1])))


def _block_diag(m):
    """(B, T, S) per-batch mask -> (B*T, B*S) block-diagonal mask (0 = masked)."""
    Bb, Tt, Ss = m.shape
    out = jnp.zeros((Bb * Tt, Bb * Ss), m.dtype)
    for b in range(Bb):
        out = out.at[b * Tt:(b + 1) * Tt, b * Ss:(b + 1) * Ss].set(m[b])
    return out


@jax.jit
def decoder_block(x, enc, src_mask, tgt_mask, params):
    """x: (B,T,D), enc: (B,S,D), src_mask: (B,T,S), tgt_mask: (B,T,T)."""
    (ln1a, ln1b, wq1, bq1, wk1, bk1, wv1, bv1, wo1, bo1,
     ln2a, ln2b, wq2, bq2, wk2, bk2, wv2, bv2, wo2, bo2,
     ln3a, ln3b, w1, b1, w2, b2) = params

    # weight segments with in-dim D, each padded to 128 lanes -> one (6, D, 128) blob
    wa = jnp.stack([
        _pad_lanes(jnp.concatenate([wq1, wk1, wv1], axis=1)),  # 0: self W_qkv
        _pad_lanes(wo1),                                       # 1: self W_o
        _pad_lanes(wq2),                                       # 2: cross W_q
        _pad_lanes(jnp.concatenate([wk2, wv2], axis=1)),       # 3: cross W_kv
        _pad_lanes(wo2),                                       # 4: cross W_o
        _pad_lanes(w1),                                        # 5: ffn W_1
    ], axis=0)

    # all biases + LN params as rows of one (13, 128) blob
    bln = jnp.concatenate([
        _pad_row(ln1a), _pad_row(ln1b),
        _pad_row(jnp.concatenate([bq1, bk1, bv1], axis=1)),
        _pad_row(bo1),
        _pad_row(ln2a), _pad_row(ln2b),
        _pad_row(bq2),
        _pad_row(jnp.concatenate([bk2, bv2], axis=1)),
        _pad_row(bo2),
        _pad_row(ln3a), _pad_row(ln3b),
        _pad_row(b1), _pad_row(b2),
    ], axis=0)

    # both masks, block-diagonal over the folded batch, packed into one input
    # (requires T == S for the stack; true for this script)
    masks = jnp.stack([_block_diag(tgt_mask), _block_diag(src_mask)], axis=0)

    x2d = x.reshape(B * T, D)
    enc2d = enc.reshape(B * S, D)

    out = pl.pallas_call(
        _decoder_block_kernel,
        out_shape=jax.ShapeDtypeStruct((B * T, D), jnp.float32),
        grid=(1,),  # single step: whole problem fits VMEM, no per-step overhead
        in_specs=[
            pl.BlockSpec((B * T, D), lambda i: (0, 0)),
            pl.BlockSpec((B * S, D), lambda i: (0, 0)),
            pl.BlockSpec((2, B * T, B * S), lambda i: (0, 0, 0)),
            pl.BlockSpec((6, D, LANES), lambda i: (0, 0, 0)),
            pl.BlockSpec((DFF, D), lambda i: (0, 0)),
            pl.BlockSpec((13, LANES), lambda i: (0, 0)),
        ],
        out_specs=pl.BlockSpec((B * T, D), lambda i: (0, 0)),
        compiler_params=pltpu.CompilerParams(dimension_semantics=("arbitrary",)),
    )(x2d, enc2d, masks, wa, w2, bln)

    return out.reshape(B, T, D)


# ---------------- pure-JAX reference (for correctness check) ---------------------
def _ref_forward(x, enc, src_mask, tgt_mask, params):
    (ln1a, ln1b, wq1, bq1, wk1, bk1, wv1, bv1, wo1, bo1,
     ln2a, ln2b, wq2, bq2, wk2, bk2, wv2, bv2, wo2, bo2,
     ln3a, ln3b, w1, b1, w2, b2) = params

    def ln(x, a, b):
        mean = x.mean(-1, keepdims=True)
        std = jnp.sqrt(((x - mean) ** 2).sum(-1, keepdims=True) / (x.shape[-1] - 1))
        return a * (x - mean) / (std + EPS) + b

    def mha(q_in, kv_in, mask, wq, bq, wk, bk, wv, bv, wo, bo):
        q = q_in @ wq + bq
        k = kv_in @ wk + bk
        v = kv_in @ wv + bv
        Bq, Tq, _ = q.shape
        Sk = k.shape[1]
        qh = q.reshape(Bq, Tq, H, DK).transpose(0, 2, 1, 3)
        kh = k.reshape(Bq, Sk, H, DK).transpose(0, 2, 1, 3)
        vh = v.reshape(Bq, Sk, H, DK).transpose(0, 2, 1, 3)
        sc = (qh @ kh.transpose(0, 1, 3, 2)) / math.sqrt(DK)
        sc = jnp.where(mask[:, None] == 0.0, -1e9, sc)
        att = jax.nn.softmax(sc, axis=-1)
        o = (att @ vh).transpose(0, 2, 1, 3).reshape(Bq, Tq, D)
        return o @ wo + bo

    x = x + mha(ln(x, ln1a, ln1b), ln(x, ln1a, ln1b), tgt_mask,
                wq1, bq1, wk1, bk1, wv1, bv1, wo1, bo1)
    n2 = ln(x, ln2a, ln2b)
    x = x + mha(n2, enc, src_mask, wq2, bq2, wk2, bk2, wv2, bv2, wo2, bo2)
    n3 = ln(x, ln3a, ln3b)
    x = x + jnp.maximum(n3 @ w1 + b1, 0.0) @ w2 + b2
    return x


# ---------------- deterministic parameter init -----------------------------------
def _init_linear(key, fan_in, fan_out):
    k1, k2 = jax.random.split(key)
    w = jax.random.normal(k1, (fan_in, fan_out), jnp.float32) / math.sqrt(fan_in)
    b = 0.01 * jax.random.normal(k2, (1, fan_out), jnp.float32)
    return w, b


def make_params(key):
    keys = jax.random.split(key, 16)
    params = []
    # residual_connections[0].norm (LayerNormalization: alpha=ones, bias=zeros)
    params += [jnp.ones((1, D), jnp.float32), jnp.zeros((1, D), jnp.float32)]
    # self_attention_block: w_q, w_k, w_v, w_o
    for i in range(4):
        params += list(_init_linear(keys[i], D, D))
    # residual_connections[1].norm
    params += [jnp.ones((1, D), jnp.float32), jnp.zeros((1, D), jnp.float32)]
    # cross_attention_block: w_q, w_k, w_v, w_o
    for i in range(4, 8):
        params += list(_init_linear(keys[i], D, D))
    # residual_connections[2].norm
    params += [jnp.ones((1, D), jnp.float32), jnp.zeros((1, D), jnp.float32)]
    # feed_forward_block: linear_1 (D->DFF), linear_2 (DFF->D)
    params += list(_init_linear(keys[8], D, DFF))
    params += list(_init_linear(keys[9], DFF, D))
    return params


if __name__ == "__main__":
    key = jax.random.PRNGKey(0)
    kx, ke, kp = jax.random.split(key, 3)

    x = jax.random.normal(kx, (B, T, D), jnp.float32)
    enc = jax.random.normal(ke, (B, S, D), jnp.float32)

    # causal target mask (B, T, T) and a padding-style source mask (B, T, S)
    tgt_mask = jnp.broadcast_to(jnp.tril(jnp.ones((T, T), jnp.float32)), (B, T, T))
    src_mask = jnp.ones((B, T, S), jnp.float32)
    src_mask = src_mask.at[0, :, S - 2:].set(0.0)  # mask last 2 source positions of batch 0

    params = make_params(kp)

    out = decoder_block(x, enc, src_mask, tgt_mask, params)
    out = jax.block_until_ready(out)

    ref = _ref_forward(x, enc, src_mask, tgt_mask, params)
    assert out.shape == (B, T, D)
    # tolerance loosened slightly vs pure-f32 to account for the EUP approx
    # reciprocal (+ Newton step) in the softmax denominator
    assert jnp.allclose(out, ref, atol=1e-3, rtol=1e-3), "Pallas output != reference"

    print("KERNEL_OK")
</pallas_src>

<mosaic_0001>
module attributes {stable_mosaic.version = 11 : i64} {
  func.func @_decoder_block_kernel(%arg0: i32, %arg1: memref<16x32xf32, #tpu.memory_space<vmem>>, %arg2: memref<16x32xf32, #tpu.memory_space<vmem>>, %arg3: memref<2x16x16xf32, #tpu.memory_space<vmem>>, %arg4: memref<6x32x128xf32, #tpu.memory_space<vmem>>, %arg5: memref<64x32xf32, #tpu.memory_space<vmem>>, %arg6: memref<13x128xf32, #tpu.memory_space<vmem>>, %arg7: memref<16x32xf32, #tpu.memory_space<vmem>>) attributes {dimension_semantics = [#tpu.dimension_semantics<arbitrary>], iteration_bounds = array<i64: 1>, scalar_prefetch = 0 : i64, scratch_operands = 0 : i64, tpu.core_type = #tpu.core_type<tc>, window_params = [{pipeline_mode = #tpu.pipeline_mode<synchronous>, transform_indices = @transform_0, window_bounds = array<i64: 16, 32>}, {pipeline_mode = #tpu.pipeline_mode<synchronous>, transform_indices = @transform_1, window_bounds = array<i64: 16, 32>}, {pipeline_mode = #tpu.pipeline_mode<synchronous>, transform_indices = @transform_2, window_bounds = array<i64: 2, 16, 16>}, {pipeline_mode = #tpu.pipeline_mode<synchronous>, transform_indices = @transform_3, window_bounds = array<i64: 6, 32, 128>}, {pipeline_mode = #tpu.pipeline_mode<synchronous>, transform_indices = @transform_4, window_bounds = array<i64: 64, 32>}, {pipeline_mode = #tpu.pipeline_mode<synchronous>, transform_indices = @transform_5, window_bounds = array<i64: 13, 128>}, {pipeline_mode = #tpu.pipeline_mode<synchronous>, transform_indices = @transform_6, window_bounds = array<i64: 16, 32>}]} {
    %c0 = arith.constant 0 : index
    %c0_0 = arith.constant 0 : index
    %0 = vector.load %arg1[%c0, %c0_0] : memref<16x32xf32, #tpu.memory_space<vmem>>, vector<16x32xf32>
    %c0_1 = arith.constant 0 : index
    %c0_2 = arith.constant 0 : index
    %1 = vector.load %arg2[%c0_1, %c0_2] : memref<16x32xf32, #tpu.memory_space<vmem>>, vector<16x32xf32>
    %c0_3 = arith.constant 0 : index
    %c0_4 = arith.constant 0 : index
    %2 = vector.load %arg6[%c0_3, %c0_4] : memref<13x128xf32, #tpu.memory_space<vmem>>, vector<1x32xf32>
    %c1 = arith.constant 1 : index
    %c0_5 = arith.constant 0 : index
    %3 = vector.load %arg6[%c1, %c0_5] : memref<13x128xf32, #tpu.memory_space<vmem>>, vector<1x32xf32>
    %cst = arith.constant dense<0.000000e+00> : vector<16xf32>
    %4 = vector.multi_reduction <add>, %0, %cst [1] : vector<16x32xf32> to vector<16xf32>
    %5 = vector.shape_cast %4 : vector<16xf32> to vector<16x1xf32>
    %cst_6 = arith.constant 3.200000e+01 : f32
    %6 = vector.broadcast %cst_6 : f32 to vector<16x1xf32>
    %7 = arith.divf %5, %6 : vector<16x1xf32>
    %8 = vector.broadcast %7 : vector<16x1xf32> to vector<16x32xf32>
    %9 = arith.subf %0, %8 : vector<16x32xf32>
    %10 = arith.mulf %9, %9 : vector<16x32xf32>
    %cst_7 = arith.constant dense<0.000000e+00> : vector<16xf32>
    %11 = vector.multi_reduction <add>, %10, %cst_7 [1] : vector<16x32xf32> to vector<16xf32>
    %12 = vector.shape_cast %11 : vector<16xf32> to vector<16x1xf32>
    %cst_8 = arith.constant 3.100000e+01 : f32
    %13 = vector.broadcast %cst_8 : f32 to vector<16x1xf32>
    %14 = arith.divf %12, %13 : vector<16x1xf32>
    %15 = math.sqrt %14 : vector<16x1xf32>
    %16 = vector.broadcast %7 : vector<16x1xf32> to vector<16x32xf32>
    %17 = arith.subf %0, %16 : vector<16x32xf32>
    %18 = vector.broadcast %2 : vector<1x32xf32> to vector<16x32xf32>
    %19 = arith.mulf %18, %17 : vector<16x32xf32>
    %cst_9 = arith.constant 9.99999997E-7 : f32
    %20 = vector.broadcast %cst_9 : f32 to vector<16x1xf32>
    %21 = arith.addf %15, %20 : vector<16x1xf32>
    %22 = vector.broadcast %21 : vector<16x1xf32> to vector<16x32xf32>
    %23 = arith.divf %19, %22 : vector<16x32xf32>
    %24 = vector.broadcast %3 : vector<1x32xf32> to vector<16x32xf32>
    %25 = arith.addf %23, %24 : vector<16x32xf32>
    %c0_10 = arith.constant 0 : index
    %c0_11 = arith.constant 0 : index
    %c0_12 = arith.constant 0 : index
    %26 = vector.load %arg4[%c0_10, %c0_11, %c0_12] : memref<6x32x128xf32, #tpu.memory_space<vmem>>, vector<1x32x128xf32>
    %27 = vector.shape_cast %26 : vector<1x32x128xf32> to vector<32x128xf32>
    %28 = vector.extract_strided_slice %27 {offsets = [0, 0], sizes = [32, 96], strides = [1, 1]} : vector<32x128xf32> to vector<32x96xf32>
    %cst_13 = arith.constant dense<0.000000e+00> : vector<16x96xf32>
    %29 = tpu.matmul %25, %28, %cst_13 {dimension_numbers = #tpu.dot_dimension_numbers<[1], [0], [0], [1], [0, 0, 1, 1], [], []>} : vector<16x32xf32>, vector<32x96xf32>, vector<16x96xf32> -> vector<16x96xf32>
    %c2 = arith.constant 2 : index
    %c0_14 = arith.constant 0 : index
    %30 = vector.load %arg6[%c2, %c0_14] : memref<13x128xf32, #tpu.memory_space<vmem>>, vector<1x96xf32>
    %31 = vector.broadcast %30 : vector<1x96xf32> to vector<16x96xf32>
    %32 = arith.addf %29, %31 : vector<16x96xf32>
    %33 = vector.extract_strided_slice %32 {offsets = [0, 0], sizes = [16, 32], strides = [1, 1]} : vector<16x96xf32> to vector<16x32xf32>
    %34 = vector.extract_strided_slice %32 {offsets = [0, 32], sizes = [16, 32], strides = [1, 1]} : vector<16x96xf32> to vector<16x32xf32>
    %35 = vector.extract_strided_slice %32 {offsets = [0, 64], sizes = [16, 32], strides = [1, 1]} : vector<16x96xf32> to vector<16x32xf32>
    %c0_15 = arith.constant 0 : index
    %c0_16 = arith.constant 0 : index
    %c0_17 = arith.constant 0 : index
    %36 = vector.load %arg3[%c0_15, %c0_16, %c0_17] : memref<2x16x16xf32, #tpu.memory_space<vmem>>, vector<1x16x16xf32>
    %37 = vector.shape_cast %36 : vector<1x16x16xf32> to vector<16x16xf32>
    %38 = vector.extract_strided_slice %33 {offsets = [0, 0], sizes = [16, 8], strides = [1, 1]} : vector<16x32xf32> to vector<16x8xf32>
    %39 = vector.extract_strided_slice %33 {offsets = [0, 8], sizes = [16, 8], strides = [1, 1]} : vector<16x32xf32> to vector<16x8xf32>
    %40 = vector.extract_strided_slice %33 {offsets = [0, 16], sizes = [16, 8], strides = [1, 1]} : vector<16x32xf32> to vector<16x8xf32>
    %41 = vector.extract_strided_slice %33 {offsets = [0, 24], sizes = [16, 8], strides = [1, 1]} : vector<16x32xf32> to vector<16x8xf32>
    %42 = vector.shape_cast %38 : vector<16x8xf32> to vector<1x16x8xf32>
    %43 = vector.shape_cast %39 : vector<16x8xf32> to vector<1x16x8xf32>
    %44 = vector.shape_cast %40 : vector<16x8xf32> to vector<1x16x8xf32>
    %45 = vector.shape_cast %41 : vector<16x8xf32> to vector<1x16x8xf32>
    %46 = tpu.concatenate %42, %43, %44, %45 in 0 : vector<1x16x8xf32>, vector<1x16x8xf32>, vector<1x16x8xf32>, vector<1x16x8xf32> -> vector<4x16x8xf32>
    %47 = vector.extract_strided_slice %34 {offsets = [0, 0], sizes = [16, 8], strides = [1, 1]} : vector<16x32xf32> to vector<16x8xf32>
    %48 = vector.extract_strided_slice %34 {offsets = [0, 8], sizes = [16, 8], strides = [1, 1]} : vector<16x32xf32> to vector<16x8xf32>
    %49 = vector.extract_strided_slice %34 {offsets = [0, 16], sizes = [16, 8], strides = [1, 1]} : vector<16x32xf32> to vector<16x8xf32>
    %50 = vector.extract_strided_slice %34 {offsets = [0, 24], sizes = [16, 8], strides = [1, 1]} : vector<16x32xf32> to vector<16x8xf32>
    %51 = vector.shape_cast %47 : vector<16x8xf32> to vector<1x16x8xf32>
    %52 = vector.shape_cast %48 : vector<16x8xf32> to vector<1x16x8xf32>
    %53 = vector.shape_cast %49 : vector<16x8xf32> to vector<1x16x8xf32>
    %54 = vector.shape_cast %50 : vector<16x8xf32> to vector<1x16x8xf32>
    %55 = tpu.concatenate %51, %52, %53, %54 in 0 : vector<1x16x8xf32>, vector<1x16x8xf32>, vector<1x16x8xf32>, vector<1x16x8xf32> -> vector<4x16x8xf32>
    %56 = vector.extract_strided_slice %35 {offsets = [0, 0], sizes = [16, 8], strides = [1, 1]} : vector<16x32xf32> to vector<16x8xf32>
    %57 = vector.extract_strided_slice %35 {offsets = [0, 8], sizes = [16, 8], strides = [1, 1]} : vector<16x32xf32> to vector<16x8xf32>
    %58 = vector.extract_strided_slice %35 {offsets = [0, 16], sizes = [16, 8], strides = [1, 1]} : vector<16x32xf32> to vector<16x8xf32>
    %59 = vector.extract_strided_slice %35 {offsets = [0, 24], sizes = [16, 8], strides = [1, 1]} : vector<16x32xf32> to vector<16x8xf32>
    %60 = vector.shape_cast %56 : vector<16x8xf32> to vector<1x16x8xf32>
    %61 = vector.shape_cast %57 : vector<16x8xf32> to vector<1x16x8xf32>
    %62 = vector.shape_cast %58 : vector<16x8xf32> to vector<1x16x8xf32>
    %63 = vector.shape_cast %59 : vector<16x8xf32> to vector<1x16x8xf32>
    %64 = tpu.concatenate %60, %61, %62, %63 in 0 : vector<1x16x8xf32>, vector<1x16x8xf32>, vector<1x16x8xf32>, vector<1x16x8xf32> -> vector<4x16x8xf32>
    %cst_18 = arith.constant dense<0.000000e+00> : vector<4x16x16xf32>
    %65 = tpu.matmul %46, %55, %cst_18 {dimension_numbers = #tpu.dot_dimension_numbers<[2], [2], [1], [1], [0, 0, 0, 1, 1, 1], [0], [0]>} : vector<4x16x8xf32>, vector<4x16x8xf32>, vector<4x16x16xf32> -> vector<4x16x16xf32>
    %cst_19 = arith.constant 0.353553385 : f32
    %66 = vector.broadcast %cst_19 : f32 to vector<4x16x16xf32>
    %67 = arith.mulf %65, %66 : vector<4x16x16xf32>
    %68 = vector.shape_cast %37 : vector<16x16xf32> to vector<1x16x16xf32>
    %cst_20 = arith.constant 0.000000e+00 : f32
    %69 = vector.broadcast %cst_20 : f32 to vector<1x16x16xf32>
    %70 = arith.cmpf oeq, %68, %69 : vector<1x16x16xf32>
    %cst_21 = arith.constant -1.000000e+09 : f32
    %71 = vector.shape_cast %70 : vector<1x16x16xi1> to vector<1x16x16xi1>
    %72 = vector.broadcast %71 : vector<1x16x16xi1> to vector<4x16x16xi1>
    %73 = vector.broadcast %cst_21 : f32 to vector<4x16x16xf32>
    %74 = arith.select %72, %73, %67 : vector<4x16x16xi1>, vector<4x16x16xf32>
    %cst_22 = arith.constant dense<0xFF800000> : vector<4x16xf32>
    %75 = vector.multi_reduction <maximumf>, %74, %cst_22 [2] : vector<4x16x16xf32> to vector<4x16xf32>
    %76 = vector.shape_cast %75 : vector<4x16xf32> to vector<4x16x1xf32>
    %77 = vector.broadcast %76 : vector<4x16x1xf32> to vector<4x16x16xf32>
    %78 = arith.subf %74, %77 : vector<4x16x16xf32>
    %79 = math.exp %78 : vector<4x16x16xf32>
    %cst_23 = arith.constant dense<0.000000e+00> : vector<4x16xf32>
    %80 = vector.multi_reduction <add>, %79, %cst_23 [2] : vector<4x16x16xf32> to vector<4x16xf32>
    %81 = vector.shape_cast %80 : vector<4x16xf32> to vector<4x16x1xf32>
    %82 = tpu.reciprocal %81 {approx = true} : vector<4x16x1xf32> -> vector<4x16x1xf32>
    %83 = arith.mulf %81, %82 : vector<4x16x1xf32>
    %cst_24 = arith.constant 2.000000e+00 : f32
    %84 = vector.broadcast %cst_24 : f32 to vector<4x16x1xf32>
    %85 = arith.subf %84, %83 : vector<4x16x1xf32>
    %86 = arith.mulf %82, %85 : vector<4x16x1xf32>
    %87 = vector.broadcast %86 : vector<4x16x1xf32> to vector<4x16x16xf32>
    %88 = arith.mulf %79, %87 : vector<4x16x16xf32>
    %cst_25 = arith.constant dense<0.000000e+00> : vector<4x16x8xf32>
    %89 = tpu.matmul %88, %64, %cst_25 {dimension_numbers = #tpu.dot_dimension_numbers<[2], [1], [1], [2], [0, 0, 0, 1, 1, 2], [0], [0]>} : vector<4x16x16xf32>, vector<4x16x8xf32>, vector<4x16x8xf32> -> vector<4x16x8xf32>
    %90 = vector.extract_strided_slice %89 {offsets = [0, 0, 0], sizes = [1, 16, 8], strides = [1, 1, 1]} : vector<4x16x8xf32> to vector<1x16x8xf32>
    %91 = vector.shape_cast %90 : vector<1x16x8xf32> to vector<16x8xf32>
    %92 = vector.extract_strided_slice %89 {offsets = [1, 0, 0], sizes = [1, 16, 8], strides = [1, 1, 1]} : vector<4x16x8xf32> to vector<1x16x8xf32>
    %93 = vector.shape_cast %92 : vector<1x16x8xf32> to vector<16x8xf32>
    %94 = vector.extract_strided_slice %89 {offsets = [2, 0, 0], sizes = [1, 16, 8], strides = [1, 1, 1]} : vector<4x16x8xf32> to vector<1x16x8xf32>
    %95 = vector.shape_cast %94 : vector<1x16x8xf32> to vector<16x8xf32>
    %96 = vector.extract_strided_slice %89 {offsets = [3, 0, 0], sizes = [1, 16, 8], strides = [1, 1, 1]} : vector<4x16x8xf32> to vector<1x16x8xf32>
    %97 = vector.shape_cast %96 : vector<1x16x8xf32> to vector<16x8xf32>
    %98 = tpu.concatenate %91, %93, %95, %97 in 1 : vector<16x8xf32>, vector<16x8xf32>, vector<16x8xf32>, vector<16x8xf32> -> vector<16x32xf32>
    %c1_26 = arith.constant 1 : index
    %c0_27 = arith.constant 0 : index
    %c0_28 = arith.constant 0 : index
    %99 = vector.load %arg4[%c1_26, %c0_27, %c0_28] : memref<6x32x128xf32, #tpu.memory_space<vmem>>, vector<1x32x128xf32>
    %100 = vector.shape_cast %99 : vector<1x32x128xf32> to vector<32x128xf32>
    %101 = vector.extract_strided_slice %100 {offsets = [0, 0], sizes = [32, 32], strides = [1, 1]} : vector<32x128xf32> to vector<32x32xf32>
    %cst_29 = arith.constant dense<0.000000e+00> : vector<16x32xf32>
    %102 = tpu.matmul %98, %101, %cst_29 {dimension_numbers = #tpu.dot_dimension_numbers<[1], [0], [0], [1], [0, 0, 1, 1], [], []>} : vector<16x32xf32>, vector<32x32xf32>, vector<16x32xf32> -> vector<16x32xf32>
    %103 = arith.addf %0, %102 : vector<16x32xf32>
    %c3 = arith.constant 3 : index
    %c0_30 = arith.constant 0 : index
    %104 = vector.load %arg6[%c3, %c0_30] : memref<13x128xf32, #tpu.memory_space<vmem>>, vector<1x32xf32>
    %105 = vector.broadcast %104 : vector<1x32xf32> to vector<16x32xf32>
    %106 = arith.addf %103, %105 : vector<16x32xf32>
    %c4 = arith.constant 4 : index
    %c0_31 = arith.constant 0 : index
    %107 = vector.load %arg6[%c4, %c0_31] : memref<13x128xf32, #tpu.memory_space<vmem>>, vector<1x32xf32>
    %c5 = arith.constant 5 : index
    %c0_32 = arith.constant 0 : index
    %108 = vector.load %arg6[%c5, %c0_32] : memref<13x128xf32, #tpu.memory_space<vmem>>, vector<1x32xf32>
    %cst_33 = arith.constant dense<0.000000e+00> : vector<16xf32>
    %109 = vector.multi_reduction <add>, %106, %cst_33 [1] : vector<16x32xf32> to vector<16xf32>
    %110 = vector.shape_cast %109 : vector<16xf32> to vector<16x1xf32>
    %cst_34 = arith.constant 3.200000e+01 : f32
    %111 = vector.broadcast %cst_34 : f32 to vector<16x1xf32>
    %112 = arith.divf %110, %111 : vector<16x1xf32>
    %113 = vector.broadcast %112 : vector<16x1xf32> to vector<16x32xf32>
    %114 = arith.subf %106, %113 : vector<16x32xf32>
    %115 = arith.mulf %114, %114 : vector<16x32xf32>
    %cst_35 = arith.constant dense<0.000000e+00> : vector<16xf32>
    %116 = vector.multi_reduction <add>, %115, %cst_35 [1] : vector<16x32xf32> to vector<16xf32>
    %117 = vector.shape_cast %116 : vector<16xf32> to vector<16x1xf32>
    %cst_36 = arith.constant 3.100000e+01 : f32
    %118 = vector.broadcast %cst_36 : f32 to vector<16x1xf32>
    %119 = arith.divf %117, %118 : vector<16x1xf32>
    %120 = math.sqrt %119 : vector<16x1xf32>
    %121 = vector.broadcast %112 : vector<16x1xf32> to vector<16x32xf32>
    %122 = arith.subf %106, %121 : vector<16x32xf32>
    %123 = vector.broadcast %107 : vector<1x32xf32> to vector<16x32xf32>
    %124 = arith.mulf %123, %122 : vector<16x32xf32>
    %cst_37 = arith.constant 9.99999997E-7 : f32
    %125 = vector.broadcast %cst_37 : f32 to vector<16x1xf32>
    %126 = arith.addf %120, %125 : vector<16x1xf32>
    %127 = vector.broadcast %126 : vector<16x1xf32> to vector<16x32xf32>
    %128 = arith.divf %124, %127 : vector<16x32xf32>
    %129 = vector.broadcast %108 : vector<1x32xf32> to vector<16x32xf32>
    %130 = arith.addf %128, %129 : vector<16x32xf32>
    %c2_38 = arith.constant 2 : index
    %c0_39 = arith.constant 0 : index
    %c0_40 = arith.constant 0 : index
    %131 = vector.load %arg4[%c2_38, %c0_39, %c0_40] : memref<6x32x128xf32, #tpu.memory_space<vmem>>, vector<1x32x128xf32>
    %132 = vector.shape_cast %131 : vector<1x32x128xf32> to vector<32x128xf32>
    %133 = vector.extract_strided_slice %132 {offsets = [0, 0], sizes = [32, 32], strides = [1, 1]} : vector<32x128xf32> to vector<32x32xf32>
    %cst_41 = arith.constant dense<0.000000e+00> : vector<16x32xf32>
    %134 = tpu.matmul %130, %133, %cst_41 {dimension_numbers = #tpu.dot_dimension_numbers<[1], [0], [0], [1], [0, 0, 1, 1], [], []>} : vector<16x32xf32>, vector<32x32xf32>, vector<16x32xf32> -> vector<16x32xf32>
    %c6 = arith.constant 6 : index
    %c0_42 = arith.constant 0 : index
    %135 = vector.load %arg6[%c6, %c0_42] : memref<13x128xf32, #tpu.memory_space<vmem>>, vector<1x32xf32>
    %136 = vector.broadcast %135 : vector<1x32xf32> to vector<16x32xf32>
    %137 = arith.addf %134, %136 : vector<16x32xf32>
    %c3_43 = arith.constant 3 : index
    %c0_44 = arith.constant 0 : index
    %c0_45 = arith.constant 0 : index
    %138 = vector.load %arg4[%c3_43, %c0_44, %c0_45] : memref<6x32x128xf32, #tpu.memory_space<vmem>>, vector<1x32x128xf32>
    %139 = vector.shape_cast %138 : vector<1x32x128xf32> to vector<32x128xf32>
    %140 = vector.extract_strided_slice %139 {offsets = [0, 0], sizes = [32, 64], strides = [1, 1]} : vector<32x128xf32> to vector<32x64xf32>
    %cst_46 = arith.constant dense<0.000000e+00> : vector<16x64xf32>
    %141 = tpu.matmul %1, %140, %cst_46 {dimension_numbers = #tpu.dot_dimension_numbers<[1], [0], [0], [1], [0, 0, 1, 1], [], []>} : vector<16x32xf32>, vector<32x64xf32>, vector<16x64xf32> -> vector<16x64xf32>
    %c7 = arith.constant 7 : index
    %c0_47 = arith.constant 0 : index
    %142 = vector.load %arg6[%c7, %c0_47] : memref<13x128xf32, #tpu.memory_space<vmem>>, vector<1x64xf32>
    %143 = vector.broadcast %142 : vector<1x64xf32> to vector<16x64xf32>
    %144 = arith.addf %141, %143 : vector<16x64xf32>
    %145 = vector.extract_strided_slice %144 {offsets = [0, 0], sizes = [16, 32], strides = [1, 1]} : vector<16x64xf32> to vector<16x32xf32>
    %146 = vector.extract_strided_slice %144 {offsets = [0, 32], sizes = [16, 32], strides = [1, 1]} : vector<16x64xf32> to vector<16x32xf32>
    %c1_48 = arith.constant 1 : index
    %c0_49 = arith.constant 0 : index
    %c0_50 = arith.constant 0 : index
    %147 = vector.load %arg3[%c1_48, %c0_49, %c0_50] : memref<2x16x16xf32, #tpu.memory_space<vmem>>, vector<1x16x16xf32>
    %148 = vector.shape_cast %147 : vector<1x16x16xf32> to vector<16x16xf32>
    %149 = vector.extract_strided_slice %137 {offsets = [0, 0], sizes = [16, 8], strides = [1, 1]} : vector<16x32xf32> to vector<16x8xf32>
    %150 = vector.extract_strided_slice %137 {offsets = [0, 8], sizes = [16, 8], strides = [1, 1]} : vector<16x32xf32> to vector<16x8xf32>
    %151 = vector.extract_strided_slice %137 {offsets = [0, 16], sizes = [16, 8], strides = [1, 1]} : vector<16x32xf32> to vector<16x8xf32>
    %152 = vector.extract_strided_slice %137 {offsets = [0, 24], sizes = [16, 8], strides = [1, 1]} : vector<16x32xf32> to vector<16x8xf32>
    %153 = vector.shape_cast %149 : vector<16x8xf32> to vector<1x16x8xf32>
    %154 = vector.shape_cast %150 : vector<16x8xf32> to vector<1x16x8xf32>
    %155 = vector.shape_cast %151 : vector<16x8xf32> to vector<1x16x8xf32>
    %156 = vector.shape_cast %152 : vector<16x8xf32> to vector<1x16x8xf32>
    %157 = tpu.concatenate %153, %154, %155, %156 in 0 : vector<1x16x8xf32>, vector<1x16x8xf32>, vector<1x16x8xf32>, vector<1x16x8xf32> -> vector<4x16x8xf32>
    %158 = vector.extract_strided_slice %145 {offsets = [0, 0], sizes = [16, 8], strides = [1, 1]} : vector<16x32xf32> to vector<16x8xf32>
    %159 = vector.extract_strided_slice %145 {offsets = [0, 8], sizes = [16, 8], strides = [1, 1]} : vector<16x32xf32> to vector<16x8xf32>
    %160 = vector.extract_strided_slice %145 {offsets = [0, 16], sizes = [16, 8], strides = [1, 1]} : vector<16x32xf32> to vector<16x8xf32>
    %161 = vector.extract_strided_slice %145 {offsets = [0, 24], sizes = [16, 8], strides = [1, 1]} : vector<16x32xf32> to vector<16x8xf32>
    %162 = vector.shape_cast %158 : vector<16x8xf32> to vector<1x16x8xf32>
    %163 = vector.shape_cast %159 : vector<16x8xf32> to vector<1x16x8xf32>
    %164 = vector.shape_cast %160 : vector<16x8xf32> to vector<1x16x8xf32>
    %165 = vector.shape_cast %161 : vector<16x8xf32> to vector<1x16x8xf32>
    %166 = tpu.concatenate %162, %163, %164, %165 in 0 : vector<1x16x8xf32>, vector<1x16x8xf32>, vector<1x16x8xf32>, vector<1x16x8xf32> -> vector<4x16x8xf32>
    %167 = vector.extract_strided_slice %146 {offsets = [0, 0], sizes = [16, 8], strides = [1, 1]} : vector<16x32xf32> to vector<16x8xf32>
    %168 = vector.extract_strided_slice %146 {offsets = [0, 8], sizes = [16, 8], strides = [1, 1]} : vector<16x32xf32> to vector<16x8xf32>
    %169 = vector.extract_strided_slice %146 {offsets = [0, 16], sizes = [16, 8], strides = [1, 1]} : vector<16x32xf32> to vector<16x8xf32>
    %170 = vector.extract_strided_slice %146 {offsets = [0, 24], sizes = [16, 8], strides = [1, 1]} : vector<16x32xf32> to vector<16x8xf32>
    %171 = vector.shape_cast %167 : vector<16x8xf32> to vector<1x16x8xf32>
    %172 = vector.shape_cast %168 : vector<16x8xf32> to vector<1x16x8xf32>
    %173 = vector.shape_cast %169 : vector<16x8xf32> to vector<1x16x8xf32>
    %174 = vector.shape_cast %170 : vector<16x8xf32> to vector<1x16x8xf32>
    %175 = tpu.concatenate %171, %172, %173, %174 in 0 : vector<1x16x8xf32>, vector<1x16x8xf32>, vector<1x16x8xf32>, vector<1x16x8xf32> -> vector<4x16x8xf32>
    %cst_51 = arith.constant dense<0.000000e+00> : vector<4x16x16xf32>
    %176 = tpu.matmul %157, %166, %cst_51 {dimension_numbers = #tpu.dot_dimension_numbers<[2], [2], [1], [1], [0, 0, 0, 1, 1, 1], [0], [0]>} : vector<4x16x8xf32>, vector<4x16x8xf32>, vector<4x16x16xf32> -> vector<4x16x16xf32>
    %cst_52 = arith.constant 0.353553385 : f32
    %177 = vector.broadcast %cst_52 : f32 to vector<4x16x16xf32>
    %178 = arith.mulf %176, %177 : vector<4x16x16xf32>
    %179 = vector.shape_cast %148 : vector<16x16xf32> to vector<1x16x16xf32>
    %cst_53 = arith.constant 0.000000e+00 : f32
    %180 = vector.broadcast %cst_53 : f32 to vector<1x16x16xf32>
    %181 = arith.cmpf oeq, %179, %180 : vector<1x16x16xf32>
    %cst_54 = arith.constant -1.000000e+09 : f32
    %182 = vector.shape_cast %181 : vector<1x16x16xi1> to vector<1x16x16xi1>
    %183 = vector.broadcast %182 : vector<1x16x16xi1> to vector<4x16x16xi1>
    %184 = vector.broadcast %cst_54 : f32 to vector<4x16x16xf32>
    %185 = arith.select %183, %184, %178 : vector<4x16x16xi1>, vector<4x16x16xf32>
    %cst_55 = arith.constant dense<0xFF800000> : vector<4x16xf32>
    %186 = vector.multi_reduction <maximumf>, %185, %cst_55 [2] : vector<4x16x16xf32> to vector<4x16xf32>
    %187 = vector.shape_cast %186 : vector<4x16xf32> to vector<4x16x1xf32>
    %188 = vector.broadcast %187 : vector<4x16x1xf32> to vector<4x16x16xf32>
    %189 = arith.subf %185, %188 : vector<4x16x16xf32>
    %190 = math.exp %189 : vector<4x16x16xf32>
    %cst_56 = arith.constant dense<0.000000e+00> : vector<4x16xf32>
    %191 = vector.multi_reduction <add>, %190, %cst_56 [2] : vector<4x16x16xf32> to vector<4x16xf32>
    %192 = vector.shape_cast %191 : vector<4x16xf32> to vector<4x16x1xf32>
    %193 = tpu.reciprocal %192 {approx = true} : vector<4x16x1xf32> -> vector<4x16x1xf32>
    %194 = arith.mulf %192, %193 : vector<4x16x1xf32>
    %cst_57 = arith.constant 2.000000e+00 : f32
    %195 = vector.broadcast %cst_57 : f32 to vector<4x16x1xf32>
    %196 = arith.subf %195, %194 : vector<4x16x1xf32>
    %197 = arith.mulf %193, %196 : vector<4x16x1xf32>
    %198 = vector.broadcast %197 : vector<4x16x1xf32> to vector<4x16x16xf32>
    %199 = arith.mulf %190, %198 : vector<4x16x16xf32>
    %cst_58 = arith.constant dense<0.000000e+00> : vector<4x16x8xf32>
    %200 = tpu.matmul %199, %175, %cst_58 {dimension_numbers = #tpu.dot_dimension_numbers<[2], [1], [1], [2], [0, 0, 0, 1, 1, 2], [0], [0]>} : vector<4x16x16xf32>, vector<4x16x8xf32>, vector<4x16x8xf32> -> vector<4x16x8xf32>
    %201 = vector.extract_strided_slice %200 {offsets = [0, 0, 0], sizes = [1, 16, 8], strides = [1, 1, 1]} : vector<4x16x8xf32> to vector<1x16x8xf32>
    %202 = vector.shape_cast %201 : vector<1x16x8xf32> to vector<16x8xf32>
    %203 = vector.extract_strided_slice %200 {offsets = [1, 0, 0], sizes = [1, 16, 8], strides = [1, 1, 1]} : vector<4x16x8xf32> to vector<1x16x8xf32>
    %204 = vector.shape_cast %203 : vector<1x16x8xf32> to vector<16x8xf32>
    %205 = vector.extract_strided_slice %200 {offsets = [2, 0, 0], sizes = [1, 16, 8], strides = [1, 1, 1]} : vector<4x16x8xf32> to vector<1x16x8xf32>
    %206 = vector.shape_cast %205 : vector<1x16x8xf32> to vector<16x8xf32>
    %207 = vector.extract_strided_slice %200 {offsets = [3, 0, 0], sizes = [1, 16, 8], strides = [1, 1, 1]} : vector<4x16x8xf32> to vector<1x16x8xf32>
    %208 = vector.shape_cast %207 : vector<1x16x8xf32> to vector<16x8xf32>
    %209 = tpu.concatenate %202, %204, %206, %208 in 1 : vector<16x8xf32>, vector<16x8xf32>, vector<16x8xf32>, vector<16x8xf32> -> vector<16x32xf32>
    %c4_59 = arith.constant 4 : index
    %c0_60 = arith.constant 0 : index
    %c0_61 = arith.constant 0 : index
    %210 = vector.load %arg4[%c4_59, %c0_60, %c0_61] : memref<6x32x128xf32, #tpu.memory_space<vmem>>, vector<1x32x128xf32>
    %211 = vector.shape_cast %210 : vector<1x32x128xf32> to vector<32x128xf32>
    %212 = vector.extract_strided_slice %211 {offsets = [0, 0], sizes = [32, 32], strides = [1, 1]} : vector<32x128xf32> to vector<32x32xf32>
    %cst_62 = arith.constant dense<0.000000e+00> : vector<16x32xf32>
    %213 = tpu.matmul %209, %212, %cst_62 {dimension_numbers = #tpu.dot_dimension_numbers<[1], [0], [0], [1], [0, 0, 1, 1], [], []>} : vector<16x32xf32>, vector<32x32xf32>, vector<16x32xf32> -> vector<16x32xf32>
    %214 = arith.addf %106, %213 : vector<16x32xf32>
    %c8 = arith.constant 8 : index
    %c0_63 = arith.constant 0 : index
    %215 = vector.load %arg6[%c8, %c0_63] : memref<13x128xf32, #tpu.memory_space<vmem>>, vector<1x32xf32>
    %216 = vector.broadcast %215 : vector<1x32xf32> to vector<16x32xf32>
    %217 = arith.addf %214, %216 : vector<16x32xf32>
    %c9 = arith.constant 9 : index
    %c0_64 = arith.constant 0 : index
    %218 = vector.load %arg6[%c9, %c0_64] : memref<13x128xf32, #tpu.memory_space<vmem>>, vector<1x32xf32>
    %c10 = arith.constant 10 : index
    %c0_65 = arith.constant 0 : index
    %219 = vector.load %arg6[%c10, %c0_65] : memref<13x128xf32, #tpu.memory_space<vmem>>, vector<1x32xf32>
    %cst_66 = arith.constant dense<0.000000e+00> : vector<16xf32>
    %220 = vector.multi_reduction <add>, %217, %cst_66 [1] : vector<16x32xf32> to vector<16xf32>
    %221 = vector.shape_cast %220 : vector<16xf32> to vector<16x1xf32>
    %cst_67 = arith.constant 3.200000e+01 : f32
    %222 = vector.broadcast %cst_67 : f32 to vector<16x1xf32>
    %223 = arith.divf %221, %222 : vector<16x1xf32>
    %224 = vector.broadcast %223 : vector<16x1xf32> to vector<16x32xf32>
    %225 = arith.subf %217, %224 : vector<16x32xf32>
    %226 = arith.mulf %225, %225 : vector<16x32xf32>
    %cst_68 = arith.constant dense<0.000000e+00> : vector<16xf32>
    %227 = vector.multi_reduction <add>, %226, %cst_68 [1] : vector<16x32xf32> to vector<16xf32>
    %228 = vector.shape_cast %227 : vector<16xf32> to vector<16x1xf32>
    %cst_69 = arith.constant 3.100000e+01 : f32
    %229 = vector.broadcast %cst_69 : f32 to vector<16x1xf32>
    %230 = arith.divf %228, %229 : vector<16x1xf32>
    %231 = math.sqrt %230 : vector<16x1xf32>
    %232 = vector.broadcast %223 : vector<16x1xf32> to vector<16x32xf32>
    %233 = arith.subf %217, %232 : vector<16x32xf32>
    %234 = vector.broadcast %218 : vector<1x32xf32> to vector<16x32xf32>
    %235 = arith.mulf %234, %233 : vector<16x32xf32>
    %cst_70 = arith.constant 9.99999997E-7 : f32
    %236 = vector.broadcast %cst_70 : f32 to vector<16x1xf32>
    %237 = arith.addf %231, %236 : vector<16x1xf32>
    %238 = vector.broadcast %237 : vector<16x1xf32> to vector<16x32xf32>
    %239 = arith.divf %235, %238 : vector<16x32xf32>
    %240 = vector.broadcast %219 : vector<1x32xf32> to vector<16x32xf32>
    %241 = arith.addf %239, %240 : vector<16x32xf32>
    %c5_71 = arith.constant 5 : index
    %c0_72 = arith.constant 0 : index
    %c0_73 = arith.constant 0 : index
    %242 = vector.load %arg4[%c5_71, %c0_72, %c0_73] : memref<6x32x128xf32, #tpu.memory_space<vmem>>, vector<1x32x128xf32>
    %243 = vector.shape_cast %242 : vector<1x32x128xf32> to vector<32x128xf32>
    %244 = vector.extract_strided_slice %243 {offsets = [0, 0], sizes = [32, 64], strides = [1, 1]} : vector<32x128xf32> to vector<32x64xf32>
    %cst_74 = arith.constant dense<0.000000e+00> : vector<16x64xf32>
    %245 = tpu.matmul %241, %244, %cst_74 {dimension_numbers = #tpu.dot_dimension_numbers<[1], [0], [0], [1], [0, 0, 1, 1], [], []>} : vector<16x32xf32>, vector<32x64xf32>, vector<16x64xf32> -> vector<16x64xf32>
    %c11 = arith.constant 11 : index
    %c0_75 = arith.constant 0 : index
    %246 = vector.load %arg6[%c11, %c0_75] : memref<13x128xf32, #tpu.memory_space<vmem>>, vector<1x64xf32>
    %247 = vector.broadcast %246 : vector<1x64xf32> to vector<16x64xf32>
    %248 = arith.addf %245, %247 : vector<16x64xf32>
    %cst_76 = arith.constant 0.000000e+00 : f32
    %249 = vector.broadcast %cst_76 : f32 to vector<16x64xf32>
    %250 = arith.maximumf %248, %249 : vector<16x64xf32>
    %c0_77 = arith.constant 0 : index
    %c0_78 = arith.constant 0 : index
    %251 = vector.load %arg5[%c0_77, %c0_78] : memref<64x32xf32, #tpu.memory_space<vmem>>, vector<64x32xf32>
    %cst_79 = arith.constant dense<0.000000e+00> : vector<16x32xf32>
    %252 = tpu.matmul %250, %251, %cst_79 {dimension_numbers = #tpu.dot_dimension_numbers<[1], [0], [0], [1], [0, 0, 1, 1], [], []>} : vector<16x64xf32>, vector<64x32xf32>, vector<16x32xf32> -> vector<16x32xf32>
    %253 = arith.addf %217, %252 : vector<16x32xf32>
    %c12 = arith.constant 12 : index
    %c0_80 = arith.constant 0 : index
    %254 = vector.load %arg6[%c12, %c0_80] : memref<13x128xf32, #tpu.memory_space<vmem>>, vector<1x32xf32>
    %255 = vector.broadcast %254 : vector<1x32xf32> to vector<16x32xf32>
    %256 = arith.addf %253, %255 : vector<16x32xf32>
    %c0_81 = arith.constant 0 : index
    %c0_82 = arith.constant 0 : index
    %257 = vector.load %arg7[%c0_81, %c0_82] : memref<16x32xf32, #tpu.memory_space<vmem>>, vector<16x32xf32>
    tpu.vector_store %arg7[%c0_81, %c0_82], %256 {strides = array<i32>} : memref<16x32xf32, #tpu.memory_space<vmem>>, vector<16x32xf32>,
    return
  }
  func.func @transform_0(%arg0: i32) -> (i32, i32) {
    %c0_i32 = arith.constant 0 : i32
    %c0_i32_0 = arith.constant 0 : i32
    %c0_i32_1 = arith.constant 0 : i32
    return %c0_i32, %c0_i32_0 : i32, i32
  }
  func.func @transform_1(%arg0: i32) -> (i32, i32) {
    %c0_i32 = arith.constant 0 : i32
    %c0_i32_0 = arith.constant 0 : i32
    %c0_i32_1 = arith.constant 0 : i32
    return %c0_i32, %c0_i32_0 : i32, i32
  }
  func.func @transform_2(%arg0: i32) -> (i32, i32, i32) {
    %c0_i32 = arith.constant 0 : i32
    %c0_i32_0 = arith.constant 0 : i32
    %c0_i32_1 = arith.constant 0 : i32
    %c0_i32_2 = arith.constant 0 : i32
    return %c0_i32, %c0_i32_0, %c0_i32_1 : i32, i32, i32
  }
  func.func @transform_3(%arg0: i32) -> (i32, i32, i32) {
    %c0_i32 = arith.constant 0 : i32
    %c0_i32_0 = arith.constant 0 : i32
    %c0_i32_1 = arith.constant 0 : i32
    %c0_i32_2 = arith.constant 0 : i32
    return %c0_i32, %c0_i32_0, %c0_i32_1 : i32, i32, i32
  }
  func.func @transform_4(%arg0: i32) -> (i32, i32) {
    %c0_i32 = arith.constant 0 : i32
    %c0_i32_0 = arith.constant 0 : i32
    %c0_i32_1 = arith.constant 0 : i32
    return %c0_i32, %c0_i32_0 : i32, i32
  }
  func.func @transform_5(%arg0: i32) -> (i32, i32) {
    %c0_i32 = arith.constant 0 : i32
    %c0_i32_0 = arith.constant 0 : i32
    %c0_i32_1 = arith.constant 0 : i32
    return %c0_i32, %c0_i32_0 : i32, i32
  }
  func.func @transform_6(%arg0: i32) -> (i32, i32) {
    %c0_i32 = arith.constant 0 : i32
    %c0_i32_0 = arith.constant 0 : i32
    %c0_i32_1 = arith.constant 0 : i32
    return %c0_i32, %c0_i32_0 : i32, i32
  }
}

</mosaic_0001>

<bundles_post_ra>
// kernel: decoder_block.1
= control target key start
LH: loop header
LB: loop body
LE: loop exit
PB: predicated region body
PF: predicated region fallthrough
CT: control target
= control target key end

     0   :  { %vm30_vm0 = vcmask 261120   ;;  %s2393_s0 = inlined_call_operand.vmem [shape: f32[16,32], index: 0, kind: input, shape index: {}]   ;;  %s2394_s1 = inlined_call_operand.vmem [shape: f32[16,32], index: 1, kind: input, shape index: {}]   ;;  %s2395_s2 = inlined_call_operand.vmem [shape: f32[2,16,16], index: 2, kind: input, shape index: {}]   ;;  %s2396_s3 = inlined_call_operand.vmem [shape: f32[6,32,128], index: 3, kind: input, shape index: {}]   ;;  %s2397_s4 = inlined_call_operand.vmem [shape: f32[64,32], index: 4, kind: input, shape index: {}]   ;;  %s2398_s5 = inlined_call_operand.vmem [shape: f32[13,128], index: 5, kind: input, shape index: {}]   ;;  %s2399_s6 = inlined_call_operand.hbm [shape: f32[16,32], index: 6, kind: output, shape index: {}]  }
   0x1   :  { %v1827_v0 = vld [vmem:[%s2393_s0 + $0x8] sm:$0xff]  ;;  %v1834_v2 = vld [vmem:[%s2393_s0] sm:$0xff] }
   0x2   :  { %v34_v1 = vsel %vm30_vm0, %v1827_v0, 0.0 }
   0x3   :  { %35 = vadd.xlane.f32.xlu0 %v34_v1 }
   0x4   :  { %11 = vsyncpa [#allocation3], 0  ;;  %v31_v3 = vsel %vm30_vm0, %v1834_v2, 0.0  ;;  %v1777_v4 = vmov 32.0   ;;  %v1778_v21 = vmov 31.0   ;;  %v130_v27 = vld [vmem:[%s2396_s3 + $0x18] sm:$0xff] }
   0x5   :  { %1659 = vrcp.f32 %v1777_v4  ;;  %v129_v28 = vld [vmem:[%s2396_s3 + $0x10] sm:$0xff]  ;;  %1590 = vmatpush.msra.mxu3 %v130_v27  ;;  %151 = vmatpush.msra.mxu0 %v130_v27  ;;  %v128_v30 = vld [vmem:[%s2396_s3 + $0x8] sm:$0xff]  ;;  %v127_v32 = vld [vmem:[%s2396_s3] sm:$0xff]  ;;  %s1779_s14 = smov 120   ;;  %s1780_s15 = smov 112   ;;  %vm182_vm15 = vcmask 64512  }
   0x6   :  { %1661 = vrcp.f32 %v1778_v21  ;;  %v1646_v62 = vld [vmem:[%s2398_s5] ss:$0 sm:$0xff]  ;;  %s1781_s16 = smov 104   ;;  %s1782_s17 = smov 96  }
   0x7   :  { %1591 = vmatpush.msra.mxu3 %v129_v28  ;;  %152 = vmatpush.msra.mxu0 %v129_v28  ;;  %s1783_s22 = smov 64   ;;  %s1784_s23 = smov 8  }
   0x8   :  { %s1785_s24 = smov 16   ;;  %s1786_s0 = smov 24  }
   0x9   :  { %1592 = vmatpush.msra.mxu3 %v128_v30  ;;  %153 = vmatpush.msra.mxu0 %v128_v30  ;;  %s1494_s18 = sshll.u32 %s2399_s6, 4  ;;  %s1787_s19 = smov [#allocation2]   ;;  %s1495_s18 = int_to_ptr.hbm [resolvable:$true] %s1494_s18 }
   0xb   :  { %32 = vadd.xlane.f32.xlu0 %v31_v3  ;;  %v1660_v5 = vpop.eup %1659  ;;  %1593 = vmatpush.msra.mxu3 %v127_v32 }
   0xc   :  { %v38_v6 = vmul.f32 32.0, %v1660_v5  ;;  %vm42_vm1 = vweird.f32 %v1660_v5  ;;  %v1662_v22 = vpop.eup %1661  ;;  %154 = vmatpush.msra.mxu0 %v127_v32 }
   0xd   :  { %v57_v23 = vmul.f32 31.0, %v1662_v22  ;;  %vm61_vm2 = vweird.f32 %v1662_v22 }
   0xe   :  { %v39_v7 = vsub.f32 1.0, %v38_v6 }
   0xf   :  { %v58_v24 = vsub.f32 1.0, %v57_v23 }
  0x10   :  { %v40_v8 = vmul.f32 %v1660_v5, %v39_v7 }
  0x11   :  { %v59_v25 = vmul.f32 %v1662_v22, %v58_v24 }
  0x12   :  { %v41_v9 = vadd.f32 %v1660_v5, %v40_v8  ;;  %v1647_v8 = vld [vmem:[%s2398_s5 + $0x1] ss:$0 sm:$0xff] }
  0x13   :  { %v60_v26 = vadd.f32 %v1662_v22, %v59_v25 }
  0x14   :  { %v1838_v10 = vsel %vm42_vm1, %v1660_v5, %v41_v9 }
  0x15   :  { %v1860_v29 = vsel %vm61_vm2, %v1662_v22, %v60_v26  ;;  %v1648_v26 = vld [vmem:[%s2398_s5 + $0x2] ss:$0 sm:$0xff]  ;;  %vm341_vm2 = vcmask 130048  }
  0x76   :  { %v36_v11 = vpop.xlane.xlu0 %35 }
  0x77   :  { %v45_v12 = vmul.f32 %v1838_v10, %v36_v11 }
  0x79   :  { %v1842_v13 = vsub.f32 %v1827_v0, %v45_v12 }
  0x7b   :  { %v49_v14 = vmul.f32 %v1842_v13, %v1842_v13  ;;  %v91_v6 = vmul.f32 %v1646_v62, %v1842_v13 }
  0x7d   :  { %v53_v15 = vsel %vm30_vm0, %v49_v14, 0.0 }
  0x7e   :  { %54 = vadd.xlane.f32.xlu1 %v53_v15  ;;  %v33_v16 = vpop.xlane.xlu0 %32 }
  0x7f   :  { %v44_v17 = vmul.f32 %v1838_v10, %v33_v16 }
  0x81   :  { %v1849_v18 = vsub.f32 %v1834_v2, %v44_v17 }
  0x83   :  { %v48_v19 = vmul.f32 %v1849_v18, %v1849_v18  ;;  %v90_v21 = vmul.f32 %v1646_v62, %v1849_v18 }
  0x85   :  { %v50_v20 = vsel %vm30_vm0, %v48_v19, 0.0 }
  0x86   :  { %51 = vadd.xlane.f32.xlu1 %v50_v20 }
  0xf1   :  { %v55_v31 = vpop.xlane.xlu1 %54 }
  0xf2   :  { %v64_v33 = vmul.f32 %v1860_v29, %v55_v31 }
  0xf4   :  { %1663 = vrsqrt.f32 %v64_v33  ;;  %vm84_vm3 = vcmp.eq.f32.partialorder %v64_v33, inf  ;;  %v87_v46 = vand.u32 2147483648, %v64_v33  ;;  %vm86_vm4 = vcmp.eq.f32.partialorder %v64_v33, 0.0 }
  0xf9   :  { %v52_v34 = vpop.xlane.xlu1 %51 }
  0xfa   :  { %v1664_v35 = vpop.eup %1663  ;;  %v63_v36 = vmul.f32 %v1860_v29, %v52_v34 }
  0xfb   :  { %v78_v37 = vmul.f32 %v1664_v35, %v64_v33 }
  0xfc   :  { %1665 = vrsqrt.f32 %v63_v36  ;;  %vm72_vm5 = vcmp.eq.f32.partialorder %v63_v36, inf  ;;  %v75_v54 = vand.u32 2147483648, %v63_v36  ;;  %vm74_vm6 = vcmp.eq.f32.partialorder %v63_v36, 0.0 }
  0xfd   :  { %v79_v38 = vmul.f32 %v1664_v35, %v78_v37 }
  0xff   :  { %v80_v39 = vmul.f32 0.5, %v79_v38 }
 0x101   :  { %v81_v40 = vsub.f32 1.5, %v80_v39 }
 0x102   :  { %v1666_v41 = vpop.eup %1665 }
 0x103   :  { %v82_v42 = vmul.f32 %v1664_v35, %v81_v40  ;;  %v66_v43 = vmul.f32 %v1666_v41, %v63_v36 }
 0x105   :  { %v83_v44 = vmul.f32 %v82_v42, %v64_v33  ;;  %v67_v45 = vmul.f32 %v1666_v41, %v66_v43 }
 0x107   :  { %v68_v47 = vmul.f32 0.5, %v67_v45  ;;  %v85_v48 = vsel %vm84_vm3, %v64_v33, %v83_v44 }
 0x108   :  { %v88_v49 = vsel %vm86_vm4, %v87_v46, %v85_v48  ;;  %v163_v46 = vld [vmem:[%s2395_s2 + $0x8] sm:$0xff]  ;;  %vm622_vm4 = vcmask 195584  }
 0x109   :  { %v69_v50 = vsub.f32 1.5, %v68_v47  ;;  %v93_v51 = vadd.f32 1e-06, %v88_v49  ;;  %vm328_vm1 = vcmp.eq.f32.partialorder %v163_v46, 0.0 }
 0x10b   :  { %v70_v52 = vmul.f32 %v1666_v41, %v69_v50  ;;  %1667 = vrcp.f32 %v93_v51  ;;  %v120_v61 = vand.u32 2147483648, %v93_v51  ;;  %v118_v1 = vand.u32 2147483647, %v93_v51  ;;  %v162_v50 = vld [vmem:[%s2395_s2] sm:$0xff] }
 0x10c   :  { %vm114_vm8 = vweird.f32 %v93_v51  ;;  %vm327_vm3 = vcmp.eq.f32.partialorder %v162_v50, 0.0 }
 0x10d   :  { %v71_v53 = vmul.f32 %v70_v52, %v63_v36  ;;  %v121_v5 = vor.u32 1.1754944e-38, %v120_v61  ;;  %vm119_vm10 = vcmp.eq.f32.partialorder %v118_v1, 8.507059e+37 }
 0x10f   :  { %v73_v55 = vsel %vm72_vm5, %v63_v36, %v71_v53 }
 0x110   :  { %v76_v56 = vsel %vm74_vm6, %v75_v54, %v73_v55 }
 0x111   :  { %v1668_v57 = vpop.eup %1667  ;;  %v92_v58 = vadd.f32 1e-06, %v76_v56 }
 0x112   :  { %v110_v59 = vmul.f32 %v1668_v57, %v93_v51  ;;  %vm115_vm7 = vweird.f32 %v1668_v57 }
 0x113   :  { %1669 = vrcp.f32 %v92_v58  ;;  %vm116_vm9 = vmor %vm114_vm8, %vm115_vm7  ;;  %v105_v15 = vand.u32 2147483648, %v92_v58  ;;  %v103_v19 = vand.u32 2147483647, %v92_v58  ;;  %vm99_vm12 = vweird.f32 %v92_v58 }
 0x114   :  { %v111_v60 = vsub.f32 1.0, %v110_v59 }
 0x115   :  { %v106_v13 = vor.u32 1.1754944e-38, %v105_v15  ;;  %vm104_vm14 = vcmp.eq.f32.partialorder %v103_v19, 8.507059e+37 }
 0x116   :  { %v112_v63 = vmul.f32 %v1668_v57, %v111_v60 }
 0x118   :  { %v113_v3 = vadd.f32 %v1668_v57, %v112_v63 }
 0x119   :  { %v1670_v4 = vpop.eup %1669 }
 0x11a   :  { %v117_v7 = vsel %vm116_vm9, %v1668_v57, %v113_v3  ;;  %v95_v9 = vmul.f32 %v1670_v4, %v92_v58  ;;  %vm100_vm11 = vweird.f32 %v1670_v4 }
 0x11b   :  { %v122_v11 = vsel %vm119_vm10, %v121_v5, %v117_v7  ;;  %vm101_vm13 = vmor %vm99_vm12, %vm100_vm11 }
 0x11c   :  { %v123_v12 = vmul.f32 %v122_v11, %v91_v6  ;;  %v96_v14 = vsub.f32 1.0, %v95_v9 }
 0x11e   :  { %v126_v16 = vadd.f32 %v1647_v8, %v123_v12  ;;  %v97_v17 = vmul.f32 %v1670_v4, %v96_v14 }
 0x120   :  { %1507 = vmatmul.msk.f32.vlgmr.msra.gmra.mxu3 %vm30_vm0, %v126_v16  ;;  %v98_v20 = vadd.f32 %v1670_v4, %v97_v17 }
 0x122   :  { %v102_v22 = vsel %vm101_vm13, %v1670_v4, %v98_v20 }
 0x123   :  { %v107_v23 = vsel %vm104_vm14, %v106_v13, %v102_v22 }
 0x124   :  { %v108_v24 = vmul.f32 %v107_v23, %v90_v21 }
 0x126   :  { %v125_v25 = vadd.f32 %v1647_v8, %v108_v24 }
 0x128   :  { %1506 = vmatmul.msk.f32.vlgmr.msra.gmra.mxu0 %vm30_vm0, %v125_v25 }
 0x1a3   :  { %v159_v27 = vpop.f32.mrf.mxu3 }
 0x1a4   :  { %v1883_v28 = vadd.f32 %v1648_v26, %v159_v27 }
 0x1a5   :  { %v156_v30 = vpop.f32.mrf.mxu0 }
 0x1a6   :  { %v1885_v31 = vadd.f32 %v1648_v26, %v156_v30  ;;  %168 = vrot.lane.b32.xlu2 %v1883_v28, %s1779_s14 }
 0x1a8   :  { %170 = vrot.lane.b32.xlu1 %v1885_v31, %s1780_s15  ;;  %166 = vrot.lane.b32.xlu0 %v1885_v31, %s1779_s14 }
 0x1ae   :  { %172 = vrot.lane.b32.xlu2 %v1883_v28, %s1780_s15 }
 0x1b6   :  { %176 = vrot.lane.b32.xlu2 %v1883_v28, %s1781_s16 }
 0x1be   :  { %174 = vrot.lane.b32.xlu2 %v1885_v31, %s1781_s16 }
 0x200   :  { %v1899_v18 = vpop.permute.xlu2 %168 }
 0x201   :  { %216 = vrot.lane.b32.xlu2 %v1899_v18, %s1782_s17 }
 0x208   :  { %v1903_v32 = vpop.permute.xlu2 %172 }
 0x209   :  { %251 = vrot.lane.b32.xlu0 %v1903_v32, %s1782_s17 }
 0x210   :  { %v1907_v33 = vpop.permute.xlu2 %176 }
 0x211   :  { %286 = vrot.lane.b32.xlu0 %v1907_v33, %s1782_s17 }
 0x218   :  { %v1921_v36 = vpop.permute.xlu2 %174 }
 0x219   :  { %178 = vrot.lane.b32.xlu0 %v1885_v31, %s1782_s17 }
 0x21a   :  { %v1913_v34 = vpop.permute.xlu1 %170  ;;  %v1915_v35 = vpop.permute.xlu0 %166 }
 0x21b   :  { %249 = vrot.lane.b32.xlu1 %v1913_v34, %s1782_s17  ;;  %214 = vrot.lane.b32.xlu2 %v1915_v35, %s1782_s17 }
 0x223   :  { %180 = vrot.lane.b32.xlu1 %v1883_v28, %s1782_s17  ;;  %284 = vrot.lane.b32.xlu2 %v1921_v36, %s1782_s17 }
 0x25b   :  { %v217_v37 = vpop.permute.xlu2 %216 }
 0x25c   :  { %1512 = vmatpush.xpose.msk.msra.mxu2 %vm182_vm15, %v217_v37 }
 0x275   :  { %v215_v38 = vpop.permute.xlu2 %214 }
 0x276   :  { %1513 = vmatpush.xpose.msk.msra.mxu2 %vm182_vm15, %v215_v38 }
 0x279   :  { %1514 = vmatmul.msk.f32.vlgmr.msra.gmra.mxu2 %vm182_vm15, %v1915_v35 }
 0x27b   :  { %v252_v39 = vpop.permute.xlu0 %251 }
 0x27c   :  { %1516 = vmatpush.xpose.msk.msrb.mxu3 %vm182_vm15, %v252_v39 }
 0x27d   :  { %v285_v41 = vpop.permute.xlu2 %284 }
 0x281   :  { %1515 = vmatmul.msk.f32.gmra.mxu2 %vm182_vm15, %v1899_v18 }
 0x283   :  { %v287_v40 = vpop.permute.xlu0 %286 }
 0x284   :  { %1520 = vmatpush.xpose.msk.msrb.mxu0 %vm182_vm15, %v287_v40 }
 0x288   :  { %1521 = vmatpush.xpose.msk.msrb.mxu0 %vm182_vm15, %v285_v41 }
 0x28b   :  { %1522 = vmatmul.msk.f32.vlgmr.msrb.gmra.mxu0 %vm182_vm15, %v1921_v36  ;;  %v179_v44 = vpop.permute.xlu0 %178 }
 0x28d   :  { %v250_v42 = vpop.permute.xlu1 %249 }
 0x28e   :  { %1517 = vmatpush.xpose.msk.msrb.mxu3 %vm182_vm15, %v250_v42 }
 0x291   :  { %1518 = vmatmul.msk.f32.vlgmr.msrb.gmra.mxu3 %vm182_vm15, %v1913_v34 }
 0x293   :  { %1523 = vmatmul.msk.f32.gmra.mxu0 %vm182_vm15, %v1907_v33 }
 0x295   :  { %v181_v43 = vpop.permute.xlu1 %180 }
 0x296   :  { %1508 = vmatpush.xpose.msk.msra.mxu1 %vm182_vm15, %v181_v43 }
 0x299   :  { %1519 = vmatmul.msk.f32.gmra.mxu3 %vm182_vm15, %v1903_v32 }
 0x29a   :  { %1509 = vmatpush.xpose.msk.msra.mxu1 %vm182_vm15, %v179_v44 }
 0x29d   :  { %1510 = vmatmul.msk.f32.vlgmr.msra.gmra.mxu1 %vm182_vm15, %v1885_v31 }
 0x2a5   :  { %1511 = vmatmul.msk.f32.gmra.mxu1 %vm182_vm15, %v1883_v28 }
 0x2fc   :  { %v243_v45 = vpop.f32.mrf.mxu2 }
 0x2fd   :  { %v321_v56 = vmul.f32 0.35355338, %v243_v45 }
 0x2ff   :  { %v335_v59 = vsel %vm327_vm3, -1e+09, %v321_v56 }
 0x300   :  { %v348_v62 = vsel %vm341_vm2, %v335_v59, -inf }
 0x304   :  { %v246_v47 = vpop.f32.mrf.mxu2 }
 0x305   :  { %v322_v48 = vmul.f32 0.35355338, %v246_v47 }
 0x307   :  { %v336_v49 = vsel %vm328_vm1, -1e+09, %v322_v48 }
 0x308   :  { %v313_v51 = vpop.f32.mrf.mxu0  ;;  %v351_v52 = vsel %vm341_vm2, %v336_v49, -inf }
 0x309   :  { %v325_v53 = vmul.f32 0.35355338, %v313_v51  ;;  %352 = vmax.xlane.f32.xlu0 %v351_v52 }
 0x30b   :  { %v339_v54 = vsel %vm327_vm3, -1e+09, %v325_v53 }
 0x30c   :  { %v360_v55 = vsel %vm341_vm2, %v339_v54, -inf }
 0x30d   :  { %361 = vmax.xlane.f32.xlu2 %v360_v55 }
 0x310   :  { %v316_v57 = vpop.f32.mrf.mxu0 }
 0x311   :  { %v326_v58 = vmul.f32 0.35355338, %v316_v57 }
 0x313   :  { %v340_v60 = vsel %vm328_vm1, -1e+09, %v326_v58  ;;  %v1606_v58 = vpack.i.bf16 %v1903_v32, %v1899_v18 }
 0x314   :  { %v278_v61 = vpop.f32.mrf.mxu3  ;;  %v363_v63 = vsel %vm341_vm2, %v340_v60, -inf }
 0x315   :  { %v323_v1 = vmul.f32 0.35355338, %v278_v61  ;;  %349 = vmax.xlane.f32.xlu2 %v348_v62  ;;  %364 = vmax.xlane.f32.xlu0 %v363_v63  ;;  %v1621_v62 = vpack.i.bf16 %v1885_v31, %v1883_v28 }
 0x317   :  { %v337_v3 = vsel %vm327_vm3, -1e+09, %v323_v1 }
 0x318   :  { %v354_v4 = vsel %vm341_vm2, %v337_v3, -inf }
 0x319   :  { %355 = vmax.xlane.f32.xlu1 %v354_v4 }
 0x31a   :  { %v208_v5 = vpop.f32.mrf.mxu1 }
 0x31b   :  { %v319_v6 = vmul.f32 0.35355338, %v208_v5 }
 0x31c   :  { %v281_v7 = vpop.f32.mrf.mxu3 }
 0x31d   :  { %v324_v8 = vmul.f32 0.35355338, %v281_v7  ;;  %v333_v9 = vsel %vm327_vm3, -1e+09, %v319_v6 }
 0x31e   :  { %v342_v11 = vsel %vm341_vm2, %v333_v9, -inf }
 0x31f   :  { %343 = vmax.xlane.f32.xlu2 %v342_v11  ;;  %v338_v12 = vsel %vm328_vm1, -1e+09, %v324_v8 }
 0x320   :  { %v357_v14 = vsel %vm341_vm2, %v338_v12, -inf }
 0x321   :  { %358 = vmax.xlane.f32.xlu1 %v357_v14 }
 0x322   :  { %v211_v15 = vpop.f32.mrf.mxu1 }
 0x323   :  { %v320_v16 = vmul.f32 0.35355338, %v211_v15 }
 0x325   :  { %v1972_v17 = vsel %vm328_vm1, -1e+09, %v320_v16 }
 0x326   :  { %v345_v19 = vsel %vm341_vm2, %v1972_v17, -inf }
 0x327   :  { %346 = vmax.xlane.f32.xlu0 %v345_v19 }
 0x37c   :  { %v353_v22 = vpop.xlane.xlu0 %352 }
 0x37d   :  { %v369_v26 = vsub.f32 %v336_v49, %v353_v22 }
 0x37f   :  { %v380_v40 = vmul.f32 1.442695, %v369_v26 }
 0x380   :  { %v362_v20 = vpop.xlane.xlu2 %361 }
 0x381   :  { %v372_v13 = vsub.f32 %v339_v54, %v362_v20  ;;  %v1611_v54 = vpack.i.bf16 %v1913_v34, %v1915_v35  ;;  %v1616_v35 = vpack.i.bf16 %v1921_v36, %v1907_v33 }
 0x383   :  { %v386_v21 = vmul.f32 1.442695, %v372_v13 }
 0x385   :  { %1671 = vpow2.f32 %v386_v21 }
 0x388   :  { %v350_v23 = vpop.xlane.xlu2 %349  ;;  %v365_v30 = vpop.xlane.xlu0 %364 }
 0x389   :  { %v368_v24 = vsub.f32 %v335_v59, %v350_v23  ;;  %v373_v41 = vsub.f32 %v340_v60, %v365_v30 }
 0x38b   :  { %v1976_v25 = vpop.eup %1671  ;;  %v378_v27 = vmul.f32 1.442695, %v368_v24  ;;  %v388_v44 = vmul.f32 1.442695, %v373_v41 }
 0x38c   :  { %v356_v37 = vpop.xlane.xlu1 %355  ;;  %v408_v38 = vsel %vm341_vm2, %v1976_v25, 0.0 }
 0x38d   :  { %1673 = vpow2.f32 %v378_v27  ;;  %v370_v39 = vsub.f32 %v337_v3, %v356_v37  ;;  %409 = vadd.xlane.f32.xlu0 %v408_v38 }
 0x38f   :  { %v382_v42 = vmul.f32 1.442695, %v370_v39 }
 0x391   :  { %1675 = vpow2.f32 %v382_v42 }
 0x392   :  { %1677 = vpow2.f32 %v380_v40  ;;  %v344_v59 = vpop.xlane.xlu2 %343 }
 0x393   :  { %v1980_v43 = vpop.eup %1673  ;;  %1679 = vpow2.f32 %v388_v44  ;;  %v366_v60 = vsub.f32 %v333_v9, %v344_v59 }
 0x394   :  { %v359_v45 = vpop.xlane.xlu1 %358  ;;  %v396_v46 = vsel %vm341_vm2, %v1980_v43, 0.0 }
 0x395   :  { %397 = vadd.xlane.f32.xlu1 %v396_v46  ;;  %v371_v48 = vsub.f32 %v338_v12, %v359_v45  ;;  %v374_v34 = vmul.f32 1.442695, %v366_v60 }
 0x397   :  { %v1984_v47 = vpop.eup %1675  ;;  %v384_v51 = vmul.f32 1.442695, %v371_v48 }
 0x398   :  { %v402_v49 = vsel %vm341_vm2, %v1984_v47, 0.0  ;;  %v1988_v50 = vpop.eup %1677 }
 0x399   :  { %403 = vadd.xlane.f32.xlu2 %v402_v49  ;;  %v399_v52 = vsel %vm341_vm2, %v1988_v50, 0.0  ;;  %v1992_v53 = vpop.eup %1679  ;;  %1681 = vpow2.f32 %v384_v51 }
 0x39a   :  { %v411_v55 = vsel %vm341_vm2, %v1992_v53, 0.0  ;;  %1683 = vpow2.f32 %v374_v34  ;;  %v347_v1 = vpop.xlane.xlu0 %346 }
 0x39b   :  { %v367_v18 = vsub.f32 %v1972_v17, %v347_v1 }
 0x39d   :  { %400 = vadd.xlane.f32.xlu1 %v399_v52  ;;  %v376_v32 = vmul.f32 1.442695, %v367_v18 }
 0x39f   :  { %v1998_v56 = vpop.eup %1681  ;;  %1685 = vpow2.f32 %v376_v32 }
 0x3a0   :  { %v405_v57 = vsel %vm341_vm2, %v1998_v56, 0.0  ;;  %v2006_v61 = vpop.eup %1683 }
 0x3a1   :  { %1612 = vrot.lane.b32.xlu0 %v1611_v54, %s1783_s22  ;;  %412 = vadd.xlane.f32.xlu2 %v411_v55  ;;  %v390_v63 = vsel %vm341_vm2, %v2006_v61, 0.0 }
 0x3a5   :  { %v2013_v3 = vpop.eup %1685 }
 0x3a6   :  { %v393_v33 = vsel %vm341_vm2, %v2013_v3, 0.0 }
 0x3a9   :  { %406 = vadd.xlane.f32.xlu2 %v405_v57 }
 0x3b6   :  { %1607 = vrot.lane.b32.xlu1 %v1606_v58, %s1783_s22 }
 0x3c1   :  { %1617 = vrot.lane.b32.xlu2 %v1616_v35, %s1783_s22 }
 0x3c9   :  { %1622 = vrot.lane.b32.xlu2 %v1621_v62, %s1783_s22 }
 0x3cb   :  { %391 = vadd.xlane.f32.xlu0 %v390_v63 }
 0x3e0   :  { %394 = vadd.xlane.f32.xlu1 %v393_v33 }
 0x400   :  { %v410_v4 = vpop.xlane.xlu0 %409 }
 0x401   :  { %1687 = vrcp.f32 %v410_v4 }
 0x407   :  { %v1688_v31 = vpop.eup %1687 }
 0x408   :  { %v398_v5 = vpop.xlane.xlu1 %397  ;;  %v428_v6 = vmul.f32 %v1688_v31, %v410_v4 }
 0x409   :  { %1689 = vrcp.f32 %v398_v5 }
 0x40a   :  { %v436_v12 = vsub.f32 2.0, %v428_v6 }
 0x40c   :  { %v404_v36 = vpop.xlane.xlu2 %403  ;;  %v444_v17 = vmul.f32 %v1688_v31, %v436_v12 }
 0x40d   :  { %1691 = vrcp.f32 %v404_v36 }
 0x40e   :  { %v452_v26 = vmul.f32 %v1976_v25, %v444_v17 }
 0x40f   :  { %v1690_v8 = vpop.eup %1689 }
 0x410   :  { %v401_v7 = vpop.xlane.xlu1 %400  ;;  %v424_v14 = vmul.f32 %v1690_v8, %v398_v5 }
 0x412   :  { %v432_v19 = vsub.f32 2.0, %v424_v14 }
 0x413   :  { %v1692_v11 = vpop.eup %1691  ;;  %v1613_v39 = vpop.permute.xlu0 %1612 }
 0x414   :  { %v413_v28 = vpop.xlane.xlu2 %412  ;;  %v426_v15 = vmul.f32 %v1692_v11, %v404_v36  ;;  %v440_v27 = vmul.f32 %v1690_v8, %v432_v19  ;;  %v1615_v48 = vunpack.i.h.bf16 %v1613_v39  ;;  %v1614_v25 = vunpack.i.l.bf16 %v1613_v39  ;;  %v1534_v8 = vld [vmem:[%s2396_s3 + $0x30] sm:$0xff] }
 0x415   :  { %1693 = vrcp.f32 %v413_v28 }
 0x416   :  { %1695 = vrcp.f32 %v401_v7  ;;  %v434_v13 = vsub.f32 2.0, %v426_v15  ;;  %v448_v46 = vmul.f32 %v1980_v43, %v440_v27 }
 0x418   :  { %v442_v37 = vmul.f32 %v1692_v11, %v434_v13  ;;  %v1532_v11 = vld [vmem:[%s2396_s3 + $0x20] sm:$0xff] }
 0x41a   :  { %v450_v49 = vmul.f32 %v1984_v47, %v442_v37 }
 0x41b   :  { %v1694_v16 = vpop.eup %1693 }
 0x41c   :  { %v407_v9 = vpop.xlane.xlu2 %406  ;;  %v1696_v20 = vpop.eup %1695  ;;  %v429_v21 = vmul.f32 %v1694_v16, %v413_v28 }
 0x41d   :  { %1697 = vrcp.f32 %v407_v9  ;;  %v425_v38 = vmul.f32 %v1696_v20, %v401_v7  ;;  %v1535_v7 = vld [vmem:[%s2396_s3 + $0x38] sm:$0xff] }
 0x41e   :  { %v437_v40 = vsub.f32 2.0, %v429_v21 }
 0x41f   :  { %v433_v51 = vsub.f32 2.0, %v425_v38 }
 0x420   :  { %v445_v52 = vmul.f32 %v1694_v16, %v437_v40 }
 0x421   :  { %v441_v43 = vmul.f32 %v1696_v20, %v433_v51 }
 0x422   :  { %v453_v60 = vmul.f32 %v1992_v53, %v445_v52 }
 0x423   :  { %v1698_v23 = vpop.eup %1697  ;;  %v449_v47 = vmul.f32 %v1988_v50, %v441_v43 }
 0x424   :  { %v1618_v22 = vpop.permute.xlu2 %1617  ;;  %v427_v41 = vmul.f32 %v1698_v23, %v407_v9  ;;  %v1533_v9 = vld [vmem:[%s2396_s3 + $0x28] sm:$0xff] }
 0x425   :  { %v1619_v24 = vunpack.i.l.bf16 %v1618_v22  ;;  %v1620_v30 = vunpack.i.h.bf16 %v1618_v22 }
 0x426   :  { %v435_v54 = vsub.f32 2.0, %v427_v41 }
 0x427   :  { %585 = vmatpush.msra.mxu0 %v1619_v24 }
 0x428   :  { %v1608_v42 = vpop.permute.xlu1 %1607  ;;  %v443_v59 = vmul.f32 %v1698_v23, %v435_v54 }
 0x429   :  { %v1610_v44 = vunpack.i.h.bf16 %v1608_v42  ;;  %586 = vmatpush.msra.mxu0 %v1620_v30  ;;  %v1609_v45 = vunpack.i.l.bf16 %v1608_v42  ;;  %v1649_v30 = vld [vmem:[%s2398_s5 + $0x3] ss:$0 sm:$0xff] }
 0x42a   :  { %1530 = vmatmul.msk.f32.vlgmr.msra.gmra.mxu0 %vm341_vm2, %v452_v26  ;;  %v451_v34 = vmul.f32 %v1998_v56, %v443_v59 }
 0x42b   :  { %515 = vmatpush.msrb.mxu2 %v1609_v45  ;;  %550 = vmatpush.msra.mxu3 %v1610_v44 }
 0x42c   :  { %v1623_v55 = vpop.permute.xlu2 %1622 }
 0x42d   :  { %516 = vmatpush.msrb.mxu2 %v1614_v25  ;;  %551 = vmatpush.msra.mxu3 %v1615_v48  ;;  %v1624_v57 = vunpack.i.l.bf16 %v1623_v55  ;;  %v1625_v58 = vunpack.i.h.bf16 %v1623_v55  ;;  %v1545_v48 = vld [vmem:[%s2396_s3 + $0x68] sm:$0xff] }
 0x42e   :  { %1526 = vmatmul.msk.f32.vlgmr.msrb.gmra.mxu2 %vm341_vm2, %v448_v46  ;;  %1528 = vmatmul.msk.f32.vlgmr.msra.gmra.mxu3 %vm341_vm2, %v450_v49  ;;  %v1547_v46 = vld [vmem:[%s2396_s3 + $0x78] sm:$0xff]  ;;  %v26_v49 = vld [vmem:[%s2394_s1] sm:$0xff] }
 0x42f   :  { %480 = vmatpush.msrb.mxu1 %v1624_v57  ;;  %810 = vmatpush.msrb.mxu3 %v1547_v46 }
 0x431   :  { %481 = vmatpush.msrb.mxu1 %v1625_v58 }
 0x432   :  { %1531 = vmatmul.msk.f32.gmra.mxu0 %vm341_vm2, %v453_v60 }
 0x433   :  { %648 = vmatpush.msra.mxu1 %v1535_v7 }
 0x435   :  { %649 = vmatpush.msra.mxu1 %v1534_v8 }
 0x436   :  { %1527 = vmatmul.msk.f32.gmra.mxu2 %vm341_vm2, %v449_v47  ;;  %1529 = vmatmul.msk.f32.gmra.mxu3 %vm341_vm2, %v451_v34  ;;  %v27_v47 = vld [vmem:[%s2394_s1 + $0x8] sm:$0xff] }
 0x437   :  { %650 = vmatpush.msra.mxu1 %v1533_v9 }
 0x439   :  { %651 = vmatpush.msra.mxu1 %v1532_v11 }
 0x43e   :  { %v392_v35 = vpop.xlane.xlu0 %391 }
 0x43f   :  { %1699 = vrcp.f32 %v392_v35 }
 0x445   :  { %v1700_v62 = vpop.eup %1699 }
 0x446   :  { %v422_v63 = vmul.f32 %v1700_v62, %v392_v35 }
 0x448   :  { %v430_v1 = vsub.f32 2.0, %v422_v63  ;;  %v1540_v63 = vld [vmem:[%s2396_s3 + $0x50] sm:$0xff] }
 0x44a   :  { %v438_v18 = vmul.f32 %v1700_v62, %v430_v1  ;;  %v1541_v62 = vld [vmem:[%s2396_s3 + $0x58] sm:$0xff] }
 0x44b   :  { %774 = vmatpush.msra.mxu2 %v1541_v62 }
 0x44c   :  { %v446_v32 = vmul.f32 %v2006_v61, %v438_v18  ;;  %v1539_v18 = vld [vmem:[%s2396_s3 + $0x48] sm:$0xff] }
 0x44d   :  { %775 = vmatpush.msra.mxu2 %v1540_v63 }
 0x44e   :  { %1524 = vmatmul.msk.f32.vlgmr.msrb.gmra.mxu1 %vm341_vm2, %v446_v32 }
 0x44f   :  { %776 = vmatpush.msra.mxu2 %v1539_v18 }
 0x453   :  { %v395_v53 = vpop.xlane.xlu1 %394 }
 0x454   :  { %1701 = vrcp.f32 %v395_v53 }
 0x45a   :  { %v1702_v33 = vpop.eup %1701 }
 0x45b   :  { %v423_v50 = vmul.f32 %v1702_v33, %v395_v53  ;;  %v1538_v53 = vld [vmem:[%s2396_s3 + $0x40] sm:$0xff] }
 0x45c   :  { %777 = vmatpush.msra.mxu2 %v1538_v53 }
 0x45d   :  { %v431_v36 = vsub.f32 2.0, %v423_v50 }
 0x45f   :  { %v439_v56 = vmul.f32 %v1702_v33, %v431_v36 }
 0x461   :  { %v447_v4 = vmul.f32 %v2013_v3, %v439_v56 }
 0x463   :  { %1525 = vmatmul.msk.f32.gmra.mxu1 %vm341_vm2, %v447_v4 }
 0x4a7   :  { %v588_v61 = vpop.f32.mrf.mxu0 }
 0x4af   :  { %v591_v3 = vpop.f32.mrf.mxu0 }
 0x4b1   :  { %v518_v5 = vpop.f32.mrf.mxu2  ;;  %v553_v28 = vpop.f32.mrf.mxu3 }
 0x4b2   :  { %596 = vrot.lane.b32.xlu2 %v518_v5, %s1784_s23 }
 0x4b9   :  { %v521_v31 = vpop.f32.mrf.mxu2  ;;  %v556_v6 = vpop.f32.mrf.mxu3 }
 0x4ba   :  { %606 = vrot.lane.b32.xlu1 %v556_v6, %s1785_s24  ;;  %604 = vrot.lane.b32.xlu2 %v553_v28, %s1785_s24 }
 0x4bb   :  { %598 = vrot.lane.b32.xlu0 %v521_v31, %s1784_s23 }
 0x4c2   :  { %612 = vrot.lane.b32.xlu2 %v588_v61, %s1786_s0 }
 0x4ca   :  { %614 = vrot.lane.b32.xlu2 %v591_v3, %s1786_s0 }
 0x4cb   :  { %v483_v15 = vpop.f32.mrf.mxu1 }
 0x4e0   :  { %v486_v21 = vpop.f32.mrf.mxu1 }
 0x50c   :  { %v597_v12 = vpop.permute.xlu2 %596 }
 0x50d   :  { %v618_v16 = vsel %vm182_vm15, %v483_v15, %v597_v12  ;;  %v1652_v15 = vld [vmem:[%s2398_s5 + $0x7] ss:$0 sm:$0xff] }
 0x514   :  { %v605_v14 = vpop.permute.xlu2 %604 }
 0x515   :  { %v620_v17 = vsel %vm341_vm2, %v618_v16, %v605_v14 }
 0x51c   :  { %v613_v19 = vpop.permute.xlu2 %612 }
 0x51d   :  { %v623_v20 = vsel %vm622_vm4, %v620_v17, %v613_v19 }
 0x51e   :  { %1536 = vmatmul.msk.f32.vlgmr.msra.gmra.mxu1 %vm30_vm0, %v623_v20  ;;  %v1650_v20 = vld [vmem:[%s2398_s5 + $0x4] ss:$0 sm:$0xff] }
 0x524   :  { %v615_v24 = vpop.permute.xlu2 %614 }
 0x52c   :  { %v607_v13 = vpop.permute.xlu1 %606 }
 0x52d   :  { %v599_v22 = vpop.permute.xlu0 %598 }
 0x52e   :  { %v619_v23 = vsel %vm182_vm15, %v486_v21, %v599_v22 }
 0x52f   :  { %v621_v26 = vsel %vm341_vm2, %v619_v23, %v607_v13 }
 0x530   :  { %v624_v27 = vsel %vm622_vm4, %v621_v26, %v615_v24 }
 0x531   :  { %1537 = vmatmul.msk.f32.gmra.mxu1 %vm30_vm0, %v624_v27 }
 0x59b   :  { %v653_v37 = vpop.f32.mrf.mxu1 }
 0x59c   :  { %v659_v38 = vadd.f32 %v653_v37, %v1834_v2  ;;  %v1546_v2 = vld [vmem:[%s2396_s3 + $0x70] sm:$0xff] }
 0x59d   :  { %811 = vmatpush.msrb.mxu3 %v1546_v2 }
 0x59e   :  { %v2063_v39 = vadd.f32 %v1649_v30, %v659_v38 }
 0x59f   :  { %812 = vmatpush.msrb.mxu3 %v1545_v48 }
 0x5a0   :  { %v667_v40 = vsel %vm30_vm0, %v2063_v39, 0.0 }
 0x5a1   :  { %668 = vadd.xlane.f32.xlu2 %v667_v40 }
 0x5ae   :  { %v656_v41 = vpop.f32.mrf.mxu1 }
 0x5af   :  { %v660_v42 = vadd.f32 %v656_v41, %v1827_v0  ;;  %v1544_v0 = vld [vmem:[%s2396_s3 + $0x60] sm:$0xff] }
 0x5b0   :  { %813 = vmatpush.msrb.mxu3 %v1544_v0  ;;  %v1651_v41 = vld [vmem:[%s2398_s5 + $0x5] ss:$0 sm:$0xff] }
 0x5b1   :  { %v2068_v44 = vadd.f32 %v1649_v30, %v660_v42  ;;  %1548 = vmatmul.msk.f32.vlgmr.msrb.gmra.mxu3 %vm30_vm0, %v26_v49 }
 0x5b3   :  { %v670_v45 = vsel %vm30_vm0, %v2068_v44, 0.0 }
 0x5b4   :  { %671 = vadd.xlane.f32.xlu0 %v670_v45 }
 0x5b9   :  { %1549 = vmatmul.msk.f32.gmra.mxu3 %vm30_vm0, %v27_v47 }
 0x614   :  { %v669_v25 = vpop.xlane.xlu2 %668 }
 0x615   :  { %v673_v51 = vmul.f32 %v669_v25, %v1838_v10 }
 0x617   :  { %v675_v52 = vsub.f32 %v2063_v39, %v673_v51 }
 0x619   :  { %v677_v54 = vmul.f32 %v675_v52, %v675_v52  ;;  %v712_v30 = vmul.f32 %v1650_v20, %v675_v52 }
 0x61b   :  { %v679_v55 = vsel %vm30_vm0, %v677_v54, 0.0 }
 0x61c   :  { %680 = vadd.xlane.f32.xlu1 %v679_v55 }
 0x627   :  { %v672_v57 = vpop.xlane.xlu0 %671 }
 0x628   :  { %v674_v58 = vmul.f32 %v672_v57, %v1838_v10 }
 0x62a   :  { %v2093_v43 = vsub.f32 %v2068_v44, %v674_v58 }
 0x62c   :  { %v678_v59 = vmul.f32 %v2093_v43, %v2093_v43 }
 0x62e   :  { %v682_v60 = vsel %vm30_vm0, %v678_v59, 0.0  ;;  %v713_v59 = vmul.f32 %v1650_v20, %v2093_v43  ;;  %v1653_v43 = vld [vmem:[%s2398_s5 + $0x6] ss:$0 sm:$0xff] }
 0x62f   :  { %683 = vadd.xlane.f32.xlu2 %v682_v60 }
 0x634   :  { %v815_v19 = vpop.f32.mrf.mxu3 }
 0x635   :  { %v2122_v21 = vadd.f32 %v1652_v15, %v815_v19 }
 0x637   :  { %844 = vrot.lane.b32.xlu1 %v2122_v21, %s1780_s15 }
 0x63c   :  { %v818_v62 = vpop.f32.mrf.mxu3 }
 0x63d   :  { %v2132_v63 = vadd.f32 %v1652_v15, %v818_v62 }
 0x63f   :  { %846 = vrot.lane.b32.xlu0 %v2132_v63, %s1780_s15  ;;  %1552 = vmatpush.xpose.msk.msrb.mxu0 %vm182_vm15, %v2132_v63 }
 0x640   :  { %842 = vrot.lane.b32.xlu1 %v2132_v63, %s1779_s14 }
 0x643   :  { %1553 = vmatpush.xpose.msk.msrb.mxu0 %vm182_vm15, %v2122_v21 }
 0x647   :  { %850 = vrot.lane.b32.xlu2 %v2132_v63, %s1781_s16  ;;  %848 = vrot.lane.b32.xlu0 %v2122_v21, %s1781_s16 }
 0x68f   :  { %v681_v34 = vpop.xlane.xlu1 %680 }
 0x690   :  { %v685_v35 = vmul.f32 %v681_v34, %v1860_v29 }
 0x692   :  { %1703 = vrsqrt.f32 %v685_v35  ;;  %vm694_vm5 = vcmp.eq.f32.partialorder %v685_v35, inf  ;;  %v697_v31 = vand.u32 2147483648, %v685_v35  ;;  %vm696_vm6 = vcmp.eq.f32.partialorder %v685_v35, 0.0 }
 0x698   :  { %v1704_v1 = vpop.eup %1703 }
 0x699   :  { %v688_v32 = vmul.f32 %v1704_v1, %v685_v35 }
 0x69b   :  { %v689_v33 = vmul.f32 %v1704_v1, %v688_v32 }
 0x69d   :  { %v690_v50 = vmul.f32 0.5, %v689_v33 }
 0x69f   :  { %v691_v36 = vsub.f32 1.5, %v690_v50 }
 0x6a1   :  { %v692_v56 = vmul.f32 %v1704_v1, %v691_v36 }
 0x6a2   :  { %v684_v4 = vpop.xlane.xlu2 %683 }
 0x6a3   :  { %v693_v5 = vmul.f32 %v692_v56, %v685_v35  ;;  %v686_v28 = vmul.f32 %v684_v4, %v1860_v29 }
 0x6a5   :  { %v695_v6 = vsel %vm694_vm5, %v685_v35, %v693_v5  ;;  %1705 = vrsqrt.f32 %v686_v28  ;;  %vm706_vm9 = vcmp.eq.f32.partialorder %v686_v28, inf  ;;  %v709_v37 = vand.u32 2147483648, %v686_v28 }
 0x6a6   :  { %v698_v61 = vsel %vm696_vm6, %v697_v31, %v695_v6  ;;  %vm708_vm12 = vcmp.eq.f32.partialorder %v686_v28, 0.0 }
 0x6a7   :  { %v714_v3 = vadd.f32 1e-06, %v698_v61 }
 0x6a9   :  { %1707 = vrcp.f32 %v714_v3  ;;  %v727_v13 = vand.u32 2147483648, %v714_v3  ;;  %v725_v24 = vand.u32 2147483647, %v714_v3  ;;  %vm721_vm8 = vweird.f32 %v714_v3  ;;  %v2167_v36 = vpop.permute.xlu1 %844 }
 0x6aa   :  { %v2158_v33 = vpop.permute.xlu2 %850 }
 0x6ab   :  { %v1706_v7 = vpop.eup %1705  ;;  %v728_v38 = vor.u32 1.1754944e-38, %v727_v13  ;;  %vm726_vm11 = vcmp.eq.f32.partialorder %v725_v24, 8.507059e+37  ;;  %1564 = vmatpush.xpose.msk.msra.mxu3 %vm182_vm15, %v2158_v33  ;;  %v1551_v24 = vld [vmem:[%s2395_s2 + $0x18] sm:$0xff] }
 0x6ac   :  { %v700_v8 = vmul.f32 %v1706_v7, %v686_v28  ;;  %vm985_vm6 = vcmp.eq.f32.partialorder %v1551_v24, 0.0 }
 0x6ae   :  { %v701_v9 = vmul.f32 %v1706_v7, %v700_v8 }
 0x6af   :  { %v1708_v11 = vpop.eup %1707 }
 0x6b0   :  { %v702_v12 = vmul.f32 0.5, %v701_v9  ;;  %v717_v14 = vmul.f32 %v1708_v11, %v714_v3  ;;  %vm722_vm7 = vweird.f32 %v1708_v11  ;;  %v1550_v9 = vld [vmem:[%s2395_s2 + $0x10] sm:$0xff] }
 0x6b1   :  { %vm723_vm10 = vmor %vm721_vm8, %vm722_vm7  ;;  %v2163_v50 = vpop.permute.xlu0 %846  ;;  %vm984_vm5 = vcmp.eq.f32.partialorder %v1550_v9, 0.0 }
 0x6b2   :  { %v703_v16 = vsub.f32 1.5, %v702_v12  ;;  %v718_v17 = vsub.f32 1.0, %v717_v14  ;;  %1560 = vmatpush.xpose.msk.msrb.mxu2 %vm182_vm15, %v2163_v50  ;;  %v2177_v5 = vpop.permute.xlu1 %842 }
 0x6b3   :  { %1556 = vmatpush.xpose.msk.msrb.mxu1 %vm182_vm15, %v2177_v5 }
 0x6b4   :  { %v704_v22 = vmul.f32 %v1706_v7, %v703_v16  ;;  %v719_v23 = vmul.f32 %v1708_v11, %v718_v17 }
 0x6b6   :  { %v705_v26 = vmul.f32 %v704_v22, %v686_v28  ;;  %v720_v27 = vadd.f32 %v1708_v11, %v719_v23  ;;  %1561 = vmatpush.xpose.msk.msrb.mxu2 %vm182_vm15, %v2167_v36 }
 0x6b8   :  { %v724_v40 = vsel %vm723_vm10, %v1708_v11, %v720_v27  ;;  %v707_v42 = vsel %vm706_vm9, %v686_v28, %v705_v26 }
 0x6b9   :  { %v729_v45 = vsel %vm726_vm11, %v728_v38, %v724_v40  ;;  %v710_v46 = vsel %vm708_vm12, %v709_v37, %v707_v42  ;;  %v2171_v56 = vpop.permute.xlu0 %848 }
 0x6ba   :  { %v730_v2 = vmul.f32 %v729_v45, %v712_v30  ;;  %v715_v48 = vadd.f32 1e-06, %v710_v46  ;;  %v1631_v4 = vpack.i.bf16 %v2171_v56, %v2167_v36  ;;  %1565 = vmatpush.xpose.msk.msra.mxu3 %vm182_vm15, %v2171_v56 }
 0x6bc   :  { %v747_v0 = vadd.f32 %v1651_v41, %v730_v2  ;;  %1709 = vrcp.f32 %v715_v48  ;;  %v742_v52 = vand.u32 2147483648, %v715_v48  ;;  %v740_v55 = vand.u32 2147483647, %v715_v48 }
 0x6bd   :  { %vm736_vm14 = vweird.f32 %v715_v48 }
 0x6be   :  { %1542 = vmatmul.msk.f32.vlgmr.msra.gmra.mxu2 %vm30_vm0, %v747_v0  ;;  %v743_v58 = vor.u32 1.1754944e-38, %v742_v52  ;;  %vm741_vm3 = vcmp.eq.f32.partialorder %v740_v55, 8.507059e+37 }
 0x6c2   :  { %v1710_v25 = vpop.eup %1709 }
 0x6c3   :  { %v732_v49 = vmul.f32 %v1710_v25, %v715_v48  ;;  %vm737_vm13 = vweird.f32 %v1710_v25 }
 0x6c4   :  { %vm738_vm1 = vmor %vm736_vm14, %vm737_vm13 }
 0x6c5   :  { %v733_v51 = vsub.f32 1.0, %v732_v49 }
 0x6c7   :  { %v734_v54 = vmul.f32 %v1710_v25, %v733_v51 }
 0x6c9   :  { %v735_v57 = vadd.f32 %v1710_v25, %v734_v54 }
 0x6cb   :  { %v739_v60 = vsel %vm738_vm1, %v1710_v25, %v735_v57 }
 0x6cc   :  { %v744_v47 = vsel %vm741_vm3, %v743_v58, %v739_v60  ;;  %vm1450_vm3 = vcmask 523264  }
 0x6cd   :  { %v745_v34 = vmul.f32 %v744_v47, %v713_v59 }
 0x6cf   :  { %v748_v35 = vadd.f32 %v1651_v41, %v745_v34 }
 0x6d1   :  { %1543 = vmatmul.msk.f32.gmra.mxu2 %vm30_vm0, %v748_v35 }
 0x741   :  { %v779_v1 = vpop.f32.mrf.mxu2 }
 0x742   :  { %v780_v18 = vadd.f32 %v1653_v43, %v779_v1 }
 0x744   :  { %834 = vrot.lane.b32.xlu0 %v780_v18, %s1781_s16  ;;  %830 = vrot.lane.b32.xlu2 %v780_v18, %s1780_s15 }
 0x745   :  { %1554 = vmatmul.msk.f32.vlgmr.msrb.gmra.mxu0 %vm182_vm15, %v780_v18 }
 0x74c   :  { %840 = vrot.lane.b32.xlu0 %v2122_v21, %s1779_s14 }
 0x754   :  { %v782_v32 = vpop.f32.mrf.mxu2 }
 0x755   :  { %v783_v53 = vadd.f32 %v1653_v43, %v782_v32 }
 0x757   :  { %836 = vrot.lane.b32.xlu1 %v783_v53, %s1781_s16  ;;  %828 = vrot.lane.b32.xlu0 %v783_v53, %s1779_s14 }
 0x758   :  { %832 = vrot.lane.b32.xlu2 %v783_v53, %s1780_s15  ;;  %1555 = vmatmul.msk.f32.gmra.mxu0 %vm182_vm15, %v783_v53 }
 0x760   :  { %826 = vrot.lane.b32.xlu2 %v780_v18, %s1779_s14 }
 0x79e   :  { %v831_v28 = vpop.permute.xlu2 %830 }
 0x79f   :  { %1562 = vmatmul.msk.f32.vlgmr.msrb.gmra.mxu2 %vm182_vm15, %v831_v28 }
 0x7b2   :  { %v833_v31 = vpop.permute.xlu2 %832 }
 0x7b3   :  { %1563 = vmatmul.msk.f32.gmra.mxu2 %vm182_vm15, %v833_v31 }
 0x7b6   :  { %v835_v6 = vpop.permute.xlu0 %834 }
 0x7b7   :  { %1566 = vmatmul.msk.f32.vlgmr.msra.gmra.mxu3 %vm182_vm15, %v835_v6 }
 0x7ba   :  { %v827_v3 = vpop.permute.xlu2 %826 }
 0x7be   :  { %v2184_v61 = vpop.permute.xlu0 %840 }
 0x7bf   :  { %1557 = vmatpush.xpose.msk.msrb.mxu1 %vm182_vm15, %v2184_v61 }
 0x7c2   :  { %1558 = vmatmul.msk.f32.vlgmr.msrb.gmra.mxu1 %vm182_vm15, %v827_v3  ;;  %v877_v38 = vpop.f32.mrf.mxu0 }
 0x7c3   :  { %v976_v41 = vmul.f32 0.35355338, %v877_v38 }
 0x7c5   :  { %v2208_v48 = vsel %vm984_vm5, -1e+09, %v976_v41 }
 0x7c6   :  { %v998_v49 = vsel %vm341_vm2, %v2208_v48, -inf }
 0x7c9   :  { %v837_v7 = vpop.permute.xlu1 %836  ;;  %v829_v8 = vpop.permute.xlu0 %828 }
 0x7ca   :  { %1567 = vmatmul.msk.f32.gmra.mxu3 %vm182_vm15, %v837_v7  ;;  %1559 = vmatmul.msk.f32.gmra.mxu1 %vm182_vm15, %v829_v8 }
 0x7d5   :  { %v880_v51 = vpop.f32.mrf.mxu0 }
 0x7d6   :  { %v977_v55 = vmul.f32 0.35355338, %v880_v51 }
 0x7d8   :  { %v991_v57 = vsel %vm985_vm6, -1e+09, %v977_v55 }
 0x7d9   :  { %v1001_v58 = vsel %vm341_vm2, %v991_v57, -inf }
 0x822   :  { %v939_v11 = vpop.f32.mrf.mxu2 }
 0x823   :  { %v980_v12 = vmul.f32 0.35355338, %v939_v11 }
 0x825   :  { %v994_v14 = vsel %vm984_vm5, -1e+09, %v980_v12 }
 0x826   :  { %v1010_v15 = vsel %vm341_vm2, %v994_v14, -inf }
 0x827   :  { %1011 = vmax.xlane.f32.xlu1 %v1010_v15 }
 0x836   :  { %v942_v19 = vpop.f32.mrf.mxu2 }
 0x837   :  { %v981_v22 = vmul.f32 0.35355338, %v942_v19 }
 0x839   :  { %v995_v37 = vsel %vm985_vm6, -1e+09, %v981_v22 }
 0x83a   :  { %v970_v16 = vpop.f32.mrf.mxu3  ;;  %v1013_v40 = vsel %vm341_vm2, %v995_v37, -inf }
 0x83b   :  { %v982_v17 = vmul.f32 0.35355338, %v970_v16 }
 0x83d   :  { %v996_v20 = vsel %vm984_vm5, -1e+09, %v982_v17 }
 0x83e   :  { %v1016_v13 = vsel %vm341_vm2, %v996_v20, -inf }
 0x83f   :  { %1017 = vmax.xlane.f32.xlu2 %v1016_v13  ;;  %v908_v23 = vpop.f32.mrf.mxu1 }
 0x840   :  { %v978_v26 = vmul.f32 0.35355338, %v908_v23 }
 0x842   :  { %v992_v27 = vsel %vm984_vm5, -1e+09, %v978_v26  ;;  %v1626_v26 = vpack.i.bf16 %v2158_v33, %v2163_v50 }
 0x843   :  { %v1004_v30 = vsel %vm341_vm2, %v992_v27, -inf }
 0x844   :  { %1005 = vmax.xlane.f32.xlu0 %v1004_v30  ;;  %v1641_v30 = vpack.i.bf16 %v2122_v21, %v2132_v63 }
 0x847   :  { %1014 = vmax.xlane.f32.xlu2 %v1013_v40  ;;  %v911_v42 = vpop.f32.mrf.mxu1 }
 0x848   :  { %v979_v45 = vmul.f32 0.35355338, %v911_v42 }
 0x84a   :  { %v993_v46 = vsel %vm985_vm6, -1e+09, %v979_v45 }
 0x84b   :  { %v1007_v2 = vsel %vm341_vm2, %v993_v46, -inf }
 0x84c   :  { %1008 = vmax.xlane.f32.xlu0 %v1007_v2 }
 0x84d   :  { %v973_v0 = vpop.f32.mrf.mxu3 }
 0x84e   :  { %v983_v25 = vmul.f32 0.35355338, %v973_v0 }
 0x84f   :  { %999 = vmax.xlane.f32.xlu2 %v998_v49 }
 0x850   :  { %v997_v52 = vsel %vm985_vm6, -1e+09, %v983_v25 }
 0x851   :  { %v1019_v54 = vsel %vm341_vm2, %v997_v52, -inf }
 0x852   :  { %1020 = vmax.xlane.f32.xlu1 %v1019_v54 }
 0x85a   :  { %1002 = vmax.xlane.f32.xlu1 %v1001_v58 }
 0x89a   :  { %v1012_v59 = vpop.xlane.xlu1 %1011 }
 0x89b   :  { %v1026_v60 = vsub.f32 %v994_v14, %v1012_v59 }
 0x89d   :  { %v1038_v47 = vmul.f32 1.442695, %v1026_v60 }
 0x89f   :  { %1711 = vpow2.f32 %v1038_v47 }
 0x8a5   :  { %v2216_v34 = vpop.eup %1711 }
 0x8a6   :  { %v1058_v35 = vsel %vm341_vm2, %v2216_v34, 0.0 }
 0x8a7   :  { %1059 = vadd.xlane.f32.xlu0 %v1058_v35 }
 0x8b2   :  { %v1018_v62 = vpop.xlane.xlu2 %1017 }
 0x8b3   :  { %v1028_v43 = vsub.f32 %v996_v20, %v1018_v62 }
 0x8b5   :  { %v1042_v1 = vmul.f32 1.442695, %v1028_v43 }
 0x8b7   :  { %1713 = vpow2.f32 %v1042_v1  ;;  %v1006_v18 = vpop.xlane.xlu0 %1005 }
 0x8b8   :  { %v1024_v32 = vsub.f32 %v992_v27, %v1006_v18  ;;  %v1636_v27 = vpack.i.bf16 %v2184_v61, %v2177_v5 }
 0x8ba   :  { %v1034_v53 = vmul.f32 1.442695, %v1024_v32  ;;  %v1015_v28 = vpop.xlane.xlu2 %1014 }
 0x8bb   :  { %v1027_v31 = vsub.f32 %v995_v37, %v1015_v28 }
 0x8bc   :  { %1715 = vpow2.f32 %v1034_v53 }
 0x8bd   :  { %v2220_v6 = vpop.eup %1713  ;;  %v1040_v3 = vmul.f32 1.442695, %v1027_v31 }
 0x8be   :  { %v1064_v7 = vsel %vm341_vm2, %v2220_v6, 0.0 }
 0x8bf   :  { %1717 = vpow2.f32 %v1040_v3  ;;  %v1009_v8 = vpop.xlane.xlu0 %1008  ;;  %1065 = vadd.xlane.f32.xlu2 %v1064_v7 }
 0x8c0   :  { %v1025_v9 = vsub.f32 %v993_v46, %v1009_v8 }
 0x8c2   :  { %v2224_v11 = vpop.eup %1715  ;;  %v1036_v12 = vmul.f32 1.442695, %v1025_v9  ;;  %v1000_v37 = vpop.xlane.xlu2 %999 }
 0x8c3   :  { %v1052_v14 = vsel %vm341_vm2, %v2224_v11, 0.0  ;;  %v1022_v33 = vsub.f32 %v2208_v48, %v1000_v37 }
 0x8c4   :  { %1719 = vpow2.f32 %v1036_v12  ;;  %1053 = vadd.xlane.f32.xlu1 %v1052_v14 }
 0x8c5   :  { %v2228_v15 = vpop.eup %1717  ;;  %v1021_v16 = vpop.xlane.xlu1 %1020  ;;  %v1030_v50 = vmul.f32 1.442695, %v1022_v33 }
 0x8c6   :  { %v1029_v17 = vsub.f32 %v997_v52, %v1021_v16  ;;  %v1061_v19 = vsel %vm341_vm2, %v2228_v15, 0.0 }
 0x8c7   :  { %1062 = vadd.xlane.f32.xlu0 %v1061_v19 }
 0x8c8   :  { %v1044_v20 = vmul.f32 1.442695, %v1029_v17 }
 0x8ca   :  { %v2232_v13 = vpop.eup %1719  ;;  %1721 = vpow2.f32 %v1044_v20 }
 0x8cb   :  { %v1055_v22 = vsel %vm341_vm2, %v2232_v13, 0.0  ;;  %1723 = vpow2.f32 %v1030_v50 }
 0x8cc   :  { %1056 = vadd.xlane.f32.xlu1 %v1055_v22 }
 0x8cd   :  { %v1003_v38 = vpop.xlane.xlu1 %1002 }
 0x8ce   :  { %v1023_v5 = vsub.f32 %v991_v57, %v1003_v38 }
 0x8d0   :  { %v2236_v23 = vpop.eup %1721  ;;  %v1032_v41 = vmul.f32 1.442695, %v1023_v5 }
 0x8d1   :  { %v1067_v24 = vsel %vm341_vm2, %v2236_v23, 0.0  ;;  %v2254_v40 = vpop.eup %1723 }
 0x8d2   :  { %1068 = vadd.xlane.f32.xlu2 %v1067_v24  ;;  %v1046_v61 = vsel %vm341_vm2, %v2254_v40, 0.0  ;;  %1725 = vpow2.f32 %v1032_v41 }
 0x8d8   :  { %v2258_v36 = vpop.eup %1725 }
 0x8d9   :  { %v1049_v21 = vsel %vm341_vm2, %v2258_v36, 0.0 }
 0x8db   :  { %1627 = vrot.lane.b32.xlu0 %v1626_v26, %s1782_s17 }
 0x8e5   :  { %1637 = vrot.lane.b32.xlu1 %v1636_v27, %s1782_s17 }
 0x8ea   :  { %1632 = vrot.lane.b32.xlu2 %v1631_v4, %s1782_s17 }
 0x8ed   :  { %1642 = vrot.lane.b32.xlu1 %v1641_v30, %s1782_s17 }
 0x905   :  { %1047 = vadd.xlane.f32.xlu0 %v1046_v61 }
 0x913   :  { %1050 = vadd.xlane.f32.xlu2 %v1049_v21 }
 0x91a   :  { %v1060_v63 = vpop.xlane.xlu0 %1059 }
 0x91b   :  { %1727 = vrcp.f32 %v1060_v63 }
 0x921   :  { %v1728_v4 = vpop.eup %1727 }
 0x922   :  { %v1082_v2 = vmul.f32 %v1728_v4, %v1060_v63 }
 0x924   :  { %v1090_v25 = vsub.f32 2.0, %v1082_v2 }
 0x926   :  { %v1098_v57 = vmul.f32 %v1728_v4, %v1090_v25  ;;  %v1576_v25 = vld [vmem:[%s2396_s3 + $0x80] sm:$0xff] }
 0x928   :  { %v1106_v53 = vmul.f32 %v2216_v34, %v1098_v57 }
 0x932   :  { %v1066_v56 = vpop.xlane.xlu2 %1065 }
 0x933   :  { %1729 = vrcp.f32 %v1066_v56 }
 0x937   :  { %v1054_v42 = vpop.xlane.xlu1 %1053 }
 0x939   :  { %v1730_v46 = vpop.eup %1729 }
 0x93a   :  { %v1063_v45 = vpop.xlane.xlu0 %1062  ;;  %v1084_v48 = vmul.f32 %v1730_v46, %v1066_v56 }
 0x93b   :  { %1731 = vrcp.f32 %v1063_v45 }
 0x93c   :  { %1733 = vrcp.f32 %v1054_v42  ;;  %v1092_v49 = vsub.f32 2.0, %v1084_v48  ;;  %v1578_v48 = vld [vmem:[%s2396_s3 + $0x90] sm:$0xff] }
 0x93e   :  { %v1100_v58 = vmul.f32 %v1730_v46, %v1092_v49 }
 0x93f   :  { %v1057_v54 = vpop.xlane.xlu1 %1056 }
 0x940   :  { %v1108_v28 = vmul.f32 %v2220_v6, %v1100_v58 }
 0x941   :  { %v1732_v51 = vpop.eup %1731 }
 0x942   :  { %v1734_v52 = vpop.eup %1733  ;;  %v1083_v59 = vmul.f32 %v1732_v51, %v1063_v45 }
 0x943   :  { %v1080_v1 = vmul.f32 %v1734_v52, %v1054_v42 }
 0x944   :  { %v1091_v31 = vsub.f32 2.0, %v1083_v59 }
 0x945   :  { %v1069_v0 = vpop.xlane.xlu2 %1068  ;;  %v1088_v7 = vsub.f32 2.0, %v1080_v1 }
 0x946   :  { %1735 = vrcp.f32 %v1069_v0  ;;  %v1099_v9 = vmul.f32 %v1732_v51, %v1091_v31 }
 0x947   :  { %1737 = vrcp.f32 %v1057_v54  ;;  %v1096_v14 = vmul.f32 %v1734_v52, %v1088_v7 }
 0x948   :  { %v1107_v34 = vmul.f32 %v2228_v15, %v1099_v9 }
 0x949   :  { %v1104_v22 = vmul.f32 %v2224_v11, %v1096_v14 }
 0x94c   :  { %v1736_v55 = vpop.eup %1735 }
 0x94d   :  { %v1085_v60 = vmul.f32 %v1736_v55, %v1069_v0  ;;  %v1633_v47 = vpop.permute.xlu2 %1632  ;;  %v1628_v35 = vpop.permute.xlu0 %1627  ;;  %v1577_v0 = vld [vmem:[%s2396_s3 + $0x88] sm:$0xff] }
 0x94e   :  { %v1630_v62 = vunpack.i.h.bf16 %v1628_v35  ;;  %v1629_v43 = vunpack.i.l.bf16 %v1628_v35  ;;  %v1635_v18 = vunpack.i.h.bf16 %v1633_v47  ;;  %v1634_v32 = vunpack.i.l.bf16 %v1633_v47  ;;  %v1738_v8 = vpop.eup %1737 }
 0x94f   :  { %v1093_v3 = vsub.f32 2.0, %v1085_v60  ;;  %v1081_v16 = vmul.f32 %v1738_v8, %v1057_v54 }
 0x950   :  { %1206 = vmatpush.msra.mxu2 %v1629_v43  ;;  %1241 = vmatpush.msrb.mxu3 %v1630_v62 }
 0x951   :  { %v1101_v12 = vmul.f32 %v1736_v55, %v1093_v3  ;;  %v1089_v24 = vsub.f32 2.0, %v1081_v16 }
 0x952   :  { %1207 = vmatpush.msra.mxu2 %v1634_v32  ;;  %1242 = vmatpush.msrb.mxu3 %v1635_v18  ;;  %v1654_v18 = vld [vmem:[%s2398_s5 + $0x8] ss:$0 sm:$0xff] }
 0x953   :  { %1572 = vmatmul.msk.f32.vlgmr.msra.gmra.mxu2 %vm341_vm2, %v1106_v53  ;;  %1574 = vmatmul.msk.f32.vlgmr.msrb.gmra.mxu3 %vm341_vm2, %v1108_v28  ;;  %v1109_v6 = vmul.f32 %v2236_v23, %v1101_v12  ;;  %v1097_v26 = vmul.f32 %v1738_v8, %v1089_v24  ;;  %v1584_v24 = vld [vmem:[%s2396_s3 + $0xb0] sm:$0xff] }
 0x955   :  { %v1105_v15 = vmul.f32 %v2232_v13, %v1097_v26 }
 0x957   :  { %v1638_v17 = vpop.permute.xlu1 %1637 }
 0x958   :  { %v1639_v19 = vunpack.i.l.bf16 %v1638_v17  ;;  %v1640_v20 = vunpack.i.h.bf16 %v1638_v17 }
 0x95a   :  { %1171 = vmatpush.msra.mxu1 %v1639_v19 }
 0x95b   :  { %1573 = vmatmul.msk.f32.gmra.mxu2 %vm341_vm2, %v1107_v34  ;;  %1575 = vmatmul.msk.f32.gmra.mxu3 %vm341_vm2, %v1109_v6 }
 0x95c   :  { %1172 = vmatpush.msra.mxu1 %v1640_v20 }
 0x95d   :  { %1570 = vmatmul.msk.f32.vlgmr.msra.gmra.mxu1 %vm341_vm2, %v1104_v22  ;;  %v1585_v22 = vld [vmem:[%s2396_s3 + $0xb8] sm:$0xff] }
 0x95e   :  { %1429 = vmatpush.msrb.mxu1 %v1585_v22 }
 0x95f   :  { %v1643_v27 = vpop.permute.xlu1 %1642 }
 0x960   :  { %v1644_v30 = vunpack.i.l.bf16 %v1643_v27  ;;  %v1645_v37 = vunpack.i.h.bf16 %v1643_v27  ;;  %1430 = vmatpush.msrb.mxu1 %v1584_v24 }
 0x962   :  { %1136 = vmatpush.msra.mxu0 %v1644_v30  ;;  %v1582_v30 = vld [vmem:[%s2396_s3 + $0xa0] sm:$0xff] }
 0x964   :  { %1137 = vmatpush.msra.mxu0 %v1645_v37 }
 0x965   :  { %1571 = vmatmul.msk.f32.gmra.mxu1 %vm341_vm2, %v1105_v15 }
 0x978   :  { %v1048_v23 = vpop.xlane.xlu0 %1047 }
 0x979   :  { %1739 = vrcp.f32 %v1048_v23 }
 0x97f   :  { %v1740_v11 = vpop.eup %1739 }
 0x980   :  { %v1078_v33 = vmul.f32 %v1740_v11, %v1048_v23 }
 0x982   :  { %v1086_v50 = vsub.f32 2.0, %v1078_v33 }
 0x984   :  { %v1094_v38 = vmul.f32 %v1740_v11, %v1086_v50 }
 0x986   :  { %v1102_v5 = vmul.f32 %v2254_v40, %v1094_v38  ;;  %v1051_v61 = vpop.xlane.xlu2 %1050 }
 0x987   :  { %1741 = vrcp.f32 %v1051_v61 }
 0x988   :  { %1568 = vmatmul.msk.f32.vlgmr.msra.gmra.mxu0 %vm341_vm2, %v1102_v5 }
 0x98d   :  { %v1742_v41 = vpop.eup %1741 }
 0x98e   :  { %v1079_v21 = vmul.f32 %v1742_v41, %v1051_v61 }
 0x990   :  { %v1087_v63 = vsub.f32 2.0, %v1079_v21 }
 0x992   :  { %v1095_v56 = vmul.f32 %v1742_v41, %v1087_v63 }
 0x994   :  { %v1103_v13 = vmul.f32 %v2258_v36, %v1095_v56  ;;  %v1579_v36 = vld [vmem:[%s2396_s3 + $0x98] sm:$0xff] }
 0x995   :  { %1303 = vmatpush.msrb.mxu0 %v1579_v36 }
 0x996   :  { %1569 = vmatmul.msk.f32.gmra.mxu0 %vm341_vm2, %v1103_v13 }
 0x997   :  { %1304 = vmatpush.msrb.mxu0 %v1578_v48  ;;  %v1446_v48 = vld [vmem:[%s2397_s4 + $0x20] sm:$0xff] }
 0x999   :  { %1305 = vmatpush.msrb.mxu0 %v1577_v0 }
 0x99b   :  { %1306 = vmatpush.msrb.mxu0 %v1576_v25 }
 0x9d6   :  { %v1209_v4 = vpop.f32.mrf.mxu2  ;;  %v1244_v42 = vpop.f32.mrf.mxu3 }
 0x9da   :  { %v1174_v45 = vpop.f32.mrf.mxu1 }
 0x9db   :  { %1252 = vrot.lane.b32.xlu1 %v1174_v45, %s1784_s23 }
 0x9de   :  { %v1212_v46 = vpop.f32.mrf.mxu2  ;;  %v1247_v2 = vpop.f32.mrf.mxu3 }
 0x9df   :  { %1262 = vrot.lane.b32.xlu0 %v1212_v46, %s1785_s24  ;;  %1270 = vrot.lane.b32.xlu2 %v1247_v2, %s1786_s0  ;;  %v1448_v46 = vld [vmem:[%s2397_s4 + $0x30] sm:$0xff] }
 0x9e2   :  { %v1177_v40 = vpop.f32.mrf.mxu1 }
 0x9e3   :  { %1260 = vrot.lane.b32.xlu1 %v1209_v4, %s1785_s24 }
 0x9eb   :  { %1268 = vrot.lane.b32.xlu1 %v1244_v42, %s1786_s0 }
 0x9f3   :  { %1254 = vrot.lane.b32.xlu1 %v1177_v40, %s1784_s23  ;;  %v1447_v40 = vld [vmem:[%s2397_s4 + $0x28] sm:$0xff] }
 0xa05   :  { %v1139_v52 = vpop.f32.mrf.mxu0 }
 0xa13   :  { %v1142_v59 = vpop.f32.mrf.mxu0 }
 0xa39   :  { %v1271_v62 = vpop.permute.xlu2 %1270 }
 0xa4d   :  { %v1253_v49 = vpop.permute.xlu1 %1252 }
 0xa4e   :  { %v1274_v54 = vsel %vm182_vm15, %v1139_v52, %v1253_v49  ;;  %v1445_v49 = vld [vmem:[%s2397_s4 + $0x18] sm:$0xff] }
 0xa51   :  { %v1263_v47 = vpop.permute.xlu0 %1262 }
 0xa55   :  { %v1261_v51 = vpop.permute.xlu1 %1260 }
 0xa56   :  { %v1276_v55 = vsel %vm341_vm2, %v1274_v54, %v1261_v51 }
 0xa5d   :  { %v1269_v57 = vpop.permute.xlu1 %1268 }
 0xa5e   :  { %v1278_v58 = vsel %vm622_vm4, %v1276_v55, %v1269_v57 }
 0xa5f   :  { %1580 = vmatmul.msk.f32.vlgmr.msrb.gmra.mxu0 %vm30_vm0, %v1278_v58 }
 0xa65   :  { %v1255_v60 = vpop.permute.xlu1 %1254 }
 0xa66   :  { %v1275_v35 = vsel %vm182_vm15, %v1142_v59, %v1255_v60  ;;  %v1655_v60 = vld [vmem:[%s2398_s5 + $0x9] ss:$0 sm:$0xff] }
 0xa67   :  { %v1277_v43 = vsel %vm341_vm2, %v1275_v35, %v1263_v47 }
 0xa68   :  { %v1279_v1 = vsel %vm622_vm4, %v1277_v43, %v1271_v62 }
 0xa69   :  { %1581 = vmatmul.msk.f32.gmra.mxu0 %vm30_vm0, %v1279_v1 }
 0xadc   :  { %v1308_v32 = vpop.f32.mrf.mxu0 }
 0xadd   :  { %v1314_v53 = vadd.f32 %v1308_v32, %v2063_v39  ;;  %v1656_v32 = vld [vmem:[%s2398_s5 + $0xa] ss:$0 sm:$0xff] }
 0xadf   :  { %v2308_v28 = vadd.f32 %v1654_v18, %v1314_v53 }
 0xae1   :  { %v1322_v31 = vsel %vm30_vm0, %v2308_v28, 0.0 }
 0xae2   :  { %1323 = vadd.xlane.f32.xlu1 %v1322_v31 }
 0xae6   :  { %v1311_v3 = vpop.f32.mrf.mxu0 }
 0xae7   :  { %v1315_v7 = vadd.f32 %v1311_v3, %v2068_v44 }
 0xae9   :  { %v2313_v8 = vadd.f32 %v1654_v18, %v1315_v7 }
 0xaeb   :  { %v1325_v9 = vsel %vm30_vm0, %v2313_v8, 0.0 }
 0xaec   :  { %1326 = vadd.xlane.f32.xlu0 %v1325_v9 }
 0xb55   :  { %v1324_v12 = vpop.xlane.xlu1 %1323 }
 0xb56   :  { %v1328_v14 = vmul.f32 %v1324_v12, %v1838_v10 }
 0xb58   :  { %v2319_v39 = vsub.f32 %v2308_v28, %v1328_v14 }
 0xb5a   :  { %v1332_v16 = vmul.f32 %v2319_v39, %v2319_v39  ;;  %v1367_v1 = vmul.f32 %v1655_v60, %v2319_v39 }
 0xb5c   :  { %v1334_v17 = vsel %vm30_vm0, %v1332_v16, 0.0 }
 0xb5d   :  { %1335 = vadd.xlane.f32.xlu2 %v1334_v17 }
 0xb5f   :  { %v1327_v19 = vpop.xlane.xlu0 %1326 }
 0xb60   :  { %v1329_v44 = vmul.f32 %v1327_v19, %v1838_v10  ;;  %v1583_v10 = vld [vmem:[%s2396_s3 + $0xa8] sm:$0xff]  ;;  %s1492_s3 = sshll.u32 %s1787_s19, 4  ;;  %s1493_s3 = int_to_ptr.vmem [resolvable:$true] %s1492_s3 }
 0xb61   :  { %1431 = vmatpush.msrb.mxu1 %v1583_v10  ;;  %v1443_v10 = vld [vmem:[%s2397_s4 + $0x8] sm:$0xff] }
 0xb62   :  { %v2326_v34 = vsub.f32 %v2313_v8, %v1329_v44 }
 0xb63   :  { %1432 = vmatpush.msrb.mxu1 %v1582_v30 }
 0xb64   :  { %v1333_v6 = vmul.f32 %v2326_v34, %v2326_v34  ;;  %v1368_v44 = vmul.f32 %v1655_v60, %v2326_v34  ;;  %v1442_v34 = vld [vmem:[%s2397_s4] sm:$0xff] }
 0xb66   :  { %v1337_v20 = vsel %vm30_vm0, %v1333_v6, 0.0 }
 0xb67   :  { %1338 = vadd.xlane.f32.xlu1 %v1337_v20 }
 0xbd0   :  { %v1336_v26 = vpop.xlane.xlu2 %1335 }
 0xbd1   :  { %v1340_v27 = vmul.f32 %v1336_v26, %v1860_v29  ;;  %v1444_v26 = vld [vmem:[%s2397_s4 + $0x10] sm:$0xff] }
 0xbd3   :  { %1743 = vrsqrt.f32 %v1340_v27  ;;  %vm1349_vm15 = vcmp.eq.f32.partialorder %v1340_v27, inf  ;;  %v1352_v63 = vand.u32 2147483648, %v1340_v27  ;;  %vm1351_vm2 = vcmp.eq.f32.partialorder %v1340_v27, 0.0 }
 0xbd9   :  { %v1744_v37 = vpop.eup %1743 }
 0xbda   :  { %v1343_v15 = vmul.f32 %v1744_v37, %v1340_v27  ;;  %v1339_v23 = vpop.xlane.xlu1 %1338 }
 0xbdb   :  { %v1341_v11 = vmul.f32 %v1339_v23, %v1860_v29  ;;  %v1449_v29 = vld [vmem:[%s2397_s4 + $0x38] sm:$0xff] }
 0xbdc   :  { %v1344_v33 = vmul.f32 %v1744_v37, %v1343_v15  ;;  %1465 = vmatpush.msrb.mxu2 %v1449_v29 }
 0xbdd   :  { %1745 = vrsqrt.f32 %v1341_v11  ;;  %vm1361_vm4 = vcmp.eq.f32.partialorder %v1341_v11, inf  ;;  %v1364_v25 = vand.u32 2147483648, %v1341_v11  ;;  %vm1363_vm7 = vcmp.eq.f32.partialorder %v1341_v11, 0.0 }
 0xbde   :  { %v1345_v50 = vmul.f32 0.5, %v1344_v33  ;;  %1466 = vmatpush.msrb.mxu2 %v1448_v46 }
 0xbe0   :  { %v1346_v38 = vsub.f32 1.5, %v1345_v50  ;;  %1467 = vmatpush.msrb.mxu2 %v1447_v40  ;;  %v1658_v50 = vld [vmem:[%s2398_s5 + $0xc] ss:$0 sm:$0xff] }
 0xbe2   :  { %v1347_v5 = vmul.f32 %v1744_v37, %v1346_v38  ;;  %1468 = vmatpush.msrb.mxu2 %v1446_v48 }
 0xbe3   :  { %v1746_v61 = vpop.eup %1745 }
 0xbe4   :  { %v1348_v41 = vmul.f32 %v1347_v5, %v1340_v27  ;;  %v1355_v21 = vmul.f32 %v1746_v61, %v1341_v11  ;;  %1469 = vmatpush.msrb.mxu2 %v1445_v49 }
 0xbe6   :  { %v1350_v56 = vsel %vm1349_vm15, %v1340_v27, %v1348_v41  ;;  %v1356_v13 = vmul.f32 %v1746_v61, %v1355_v21  ;;  %1470 = vmatpush.msrb.mxu2 %v1444_v26  ;;  %v1657_v27 = vld [vmem:[%s2398_s5 + $0xb] ss:$0 sm:$0xff]  ;;  %s1788_s5 = smov 128  }
 0xbe7   :  { %v1353_v4 = vsel %vm1351_vm2, %v1352_v63, %v1350_v56 }
 0xbe8   :  { %v1369_v42 = vadd.f32 1e-06, %v1353_v4  ;;  %v1357_v45 = vmul.f32 0.5, %v1356_v13  ;;  %1471 = vmatpush.msrb.mxu2 %v1443_v10 }
 0xbea   :  { %1747 = vrcp.f32 %v1369_v42  ;;  %v1358_v2 = vsub.f32 1.5, %v1357_v45  ;;  %v1382_v59 = vand.u32 2147483648, %v1369_v42  ;;  %v1380_v35 = vand.u32 2147483647, %v1369_v42  ;;  %1472 = vmatpush.msrb.mxu2 %v1442_v34 }
 0xbeb   :  { %vm1376_vm9 = vweird.f32 %v1369_v42 }
 0xbec   :  { %v1359_v36 = vmul.f32 %v1746_v61, %v1358_v2  ;;  %v1383_v43 = vor.u32 1.1754944e-38, %v1382_v59  ;;  %vm1381_vm11 = vcmp.eq.f32.partialorder %v1380_v35, 8.507059e+37 }
 0xbee   :  { %v1360_v0 = vmul.f32 %v1359_v36, %v1341_v11 }
 0xbf0   :  { %v1748_v51 = vpop.eup %1747  ;;  %v1362_v52 = vsel %vm1361_vm4, %v1341_v11, %v1360_v0 }
 0xbf1   :  { %v1372_v54 = vmul.f32 %v1748_v51, %v1369_v42  ;;  %v1365_v55 = vsel %vm1363_vm7, %v1364_v25, %v1362_v52  ;;  %vm1377_vm8 = vweird.f32 %v1748_v51 }
 0xbf2   :  { %v1370_v57 = vadd.f32 1e-06, %v1365_v55  ;;  %vm1378_vm10 = vmor %vm1376_vm9, %vm1377_vm8 }
 0xbf3   :  { %v1373_v58 = vsub.f32 1.0, %v1372_v54 }
 0xbf4   :  { %1749 = vrcp.f32 %v1370_v57  ;;  %v1397_v14 = vand.u32 2147483648, %v1370_v57  ;;  %v1395_v17 = vand.u32 2147483647, %v1370_v57  ;;  %vm1391_vm13 = vweird.f32 %v1370_v57 }
 0xbf5   :  { %v1374_v47 = vmul.f32 %v1748_v51, %v1373_v58 }
 0xbf6   :  { %v1398_v39 = vor.u32 1.1754944e-38, %v1397_v14  ;;  %vm1396_vm1 = vcmp.eq.f32.partialorder %v1395_v17, 8.507059e+37 }
 0xbf7   :  { %v1375_v62 = vadd.f32 %v1748_v51, %v1374_v47 }
 0xbf9   :  { %v1379_v18 = vsel %vm1378_vm10, %v1748_v51, %v1375_v62 }
 0xbfa   :  { %v1750_v53 = vpop.eup %1749  ;;  %v1384_v31 = vsel %vm1381_vm11, %v1383_v43, %v1379_v18 }
 0xbfb   :  { %v1385_v3 = vmul.f32 %v1384_v31, %v1367_v1  ;;  %v1387_v7 = vmul.f32 %v1750_v53, %v1370_v57  ;;  %vm1392_vm12 = vweird.f32 %v1750_v53 }
 0xbfc   :  { %vm1393_vm14 = vmor %vm1391_vm13, %vm1392_vm12 }
 0xbfd   :  { %v1402_v9 = vadd.f32 %v1656_v32, %v1385_v3  ;;  %v1388_v12 = vsub.f32 1.0, %v1387_v7 }
 0xbff   :  { %1586 = vmatmul.msk.f32.vlgmr.msrb.gmra.mxu1 %vm30_vm0, %v1402_v9  ;;  %v1389_v16 = vmul.f32 %v1750_v53, %v1388_v12 }
 0xc01   :  { %v1390_v19 = vadd.f32 %v1750_v53, %v1389_v16 }
 0xc03   :  { %v1394_v6 = vsel %vm1393_vm14, %v1750_v53, %v1390_v19 }
 0xc04   :  { %v1399_v20 = vsel %vm1396_vm1, %v1398_v39, %v1394_v6 }
 0xc05   :  { %v1400_v22 = vmul.f32 %v1399_v20, %v1368_v44 }
 0xc07   :  { %v1403_v24 = vadd.f32 %v1656_v32, %v1400_v22 }
 0xc09   :  { %1587 = vmatmul.msk.f32.gmra.mxu1 %vm30_vm0, %v1403_v24 }
 0xc7c   :  { %v1434_v30 = vpop.f32.mrf.mxu1 }
 0xc7d   :  { %v1435_v37 = vadd.f32 %v1657_v27, %v1434_v30 }
 0xc7f   :  { %v1440_v15 = vmax.f32 %v1435_v37, 0.0 }
 0xc81   :  { %1588 = vmatmul.msk.f32.vlgmr.msrb.gmra.mxu2 %vm1450_vm3, %v1440_v15 }
 0xc86   :  { %v1437_v23 = vpop.f32.mrf.mxu1 }
 0xc87   :  { %v1438_v11 = vadd.f32 %v1657_v27, %v1437_v23 }
 0xc89   :  { %v1441_v33 = vmax.f32 %v1438_v11, 0.0 }
 0xc8b   :  { %1589 = vmatmul.msk.f32.gmra.mxu2 %vm1450_vm3, %v1441_v33 }
 0xd04   :  { %v1474_v38 = vpop.f32.mrf.mxu2 }
 0xd05   :  { %v1480_v5 = vadd.f32 %v1474_v38, %v2308_v28 }
 0xd07   :  { %v1484_v61 = vadd.f32 %v1658_v50, %v1480_v5 }
 0xd09   :  { %1486 = vst.msk [vmem:[#allocation2] sm:$0xff] %vm30_vm0, %v1484_v61 }
 0xd0e   :  { %v1477_v41 = vpop.f32.mrf.mxu2 }
 0xd0f   :  { %v1481_v21 = vadd.f32 %v1477_v41, %v2313_v8 }
 0xd11   :  { %v1485_v63 = vadd.f32 %v1658_v50, %v1481_v21 }
 0xd13   :  { %1487 = vst.msk [vmem:[#allocation2 + $0x8] sm:$0xff] %vm30_vm0, %v1485_v63 }
 0xd14   :  { %1500 = dma.vmem_to_hbm [thread:$0]  %s1493_s3, 256, %s1495_s18, [#allocation3], %s1788_s5, %s1788_s5, %s1784_s23  }
 0xd15   :  { %1775 = dma.done.wait [#allocation3], 256  }
 0xd16   :  { %1776 = vsyncadd [#allocation3], 4294967040 }
 0xd17   :  { %1505 = vsyncpa [#allocation3], 1 }

</bundles_post_ra>
